<compile_context>
chip_gen: v6e
topology: v6e:2x2x1
jax: 0.10.0
libtpu: 0.0.40
codegen_flags: <defaults>
</compile_context>

<pallas_src>
import jax
import jax.numpy as jnp
from jax.experimental import pallas as pl
from jax.experimental.pallas import tpu as pltpu

# ---- synthetic config (small shapes) ----------------------------------------
B, S, D = 2, 8, 32          # batch, seq, hidden
NUM_HEADS = 2
DH = D // NUM_HEADS
FFN = 64
LINSIZE = 64                # stands in for linsize=512
NUM_LABELS = 2
VOCAB = 30
NUM_LAYERS = 2
LN_EPS = 1e-12
NEG_INF = -1e9

PK_ROWS, PK_COLS = 8, 128   # packed per-layer small-parameter slab
OUT_ROWS, OUT_COLS = 8, 128 # lane-dense packed output block


def _layernorm(x, gamma, beta):
    # single-pass stats: E[x] and E[x^2], var = E[x^2] - E[x]^2
    mu = jnp.mean(x, axis=-1, keepdims=True)
    m2 = jnp.mean(x * x, axis=-1, keepdims=True)
    var = jnp.maximum(m2 - mu * mu, 0.0)
    return (x - mu) * jax.lax.rsqrt(var + LN_EPS) * gamma + beta


# ---- fused Pallas kernel: all encoder layers + mean pool + classifier head ---
def bertamp_fused_kernel(x0_ref, bias_ref, pool_ref,
                         wqkv_ref, wo_ref, w1_ref, w2_ref, pk_ref,
                         w1h_ref, w2h_ref, hb_ref, out_ref):
    x = x0_ref[...]                     # (B*S, D) f32, resident for the whole model
    bias = bias_ref[...]                # (B*S, B*S) fused key-pad + block-diag mask
    scale = DH ** -0.5

    # NOTE: at real BERT sizes cast matmul inputs to bf16 (keep f32 accumulate),
    # tile K/N in 256-wide blocks (128 on v5e), keep the layer axis as a grid
    # dimension with bf16 stacked weights + vmem_limit_bytes budgeting for v7x,
    # and add a row-"parallel" grid axis for v7x's second TensorCore.
    for l in range(NUM_LAYERS):         # statically unrolled (NUM_LAYERS = 2)
        pk = pk_ref[l]                  # (8,128) packed biases / LN params for layer l
        bqkv = pk[0:1, 0:3 * D]
        bo   = pk[1:2, 0:D]
        ln1g = pk[2:3, 0:D]
        ln1b = pk[3:4, 0:D]
        b1   = pk[4:5, 0:FFN]
        b2   = pk[5:6, 0:D]
        ln2g = pk[6:7, 0:D]
        ln2b = pk[7:8, 0:D]
        wo = wo_ref[l]                  # (D, D)

        # fused QKV projection: one (B*S,D)@(D,3D) MXU push
        qkv = jnp.dot(x, wqkv_ref[l], preferred_element_type=jnp.float32) + bqkv

        # block-diagonal 2-D attention; heads statically unrolled (NUM_HEADS=2);
        # the output projection Wo is folded per head (no lane concatenate).
        attn = jnp.zeros((B * S, D), jnp.float32)
        for h in range(NUM_HEADS):
            qh = qkv[:, h * DH:(h + 1) * DH]                    # (B*S, DH)
            kh = qkv[:, D + h * DH:D + (h + 1) * DH]            # (B*S, DH)
            vh = qkv[:, 2 * D + h * DH:2 * D + (h + 1) * DH]    # (B*S, DH)
            s = jax.lax.dot_general(                            # Q @ K^T, 2-D only
                qh, kh, (((1,), (1,)), ((), ())),
                preferred_element_type=jnp.float32) * scale + bias
            s = s - jnp.max(s, axis=-1, keepdims=True)
            p = jnp.exp(s)
            p = p * pl.reciprocal(jnp.sum(p, axis=-1, keepdims=True), approx=True)
            ctx = jnp.dot(p, vh, preferred_element_type=jnp.float32)   # (B*S, DH)
            attn = attn + jnp.dot(ctx, wo[h * DH:(h + 1) * DH, :],
                                  preferred_element_type=jnp.float32)
        attn = attn + bo

        h1 = _layernorm(x + attn, ln1g, ln1b)

        hh = jnp.dot(h1, w1_ref[l], preferred_element_type=jnp.float32) + b1
        hh2 = hh * hh                   # reuse square instead of hh**3
        gelu = 0.5 * hh * (1.0 + jnp.tanh(0.7978845608028654 * (hh + 0.044715 * hh * hh2)))
        ffn = jnp.dot(gelu, w2_ref[l], preferred_element_type=jnp.float32) + b2

        x = _layernorm(h1 + ffn, ln2g, ln2b)

    # mean pool over seq (== torch.mean(dim=1)) as a pooling matmul, then the
    # weight-normed classifier head.
    avg = jnp.dot(pool_ref[...], x, preferred_element_type=jnp.float32)   # (B, D)
    hb = hb_ref[...]
    b1h = hb[0:1, 0:LINSIZE]
    b2h = hb[0:1, LINSIZE:LINSIZE + NUM_LABELS]
    z = jnp.dot(avg, w1h_ref[...], preferred_element_type=jnp.float32) + b1h
    z = jnp.where(z > 0.0, z, 0.01 * z)              # LeakyReLU(0.01)
    # TODO(synk): nn.Dropout(p=0.8) is identity at inference; training-mode mask omitted.
    logits = jnp.dot(z, w2h_ref[...], preferred_element_type=jnp.float32) + b2h

    # lane-dense packed output block via direct slice stores (no concatenates)
    out_ref[...] = jnp.zeros((OUT_ROWS, OUT_COLS), jnp.float32)
    out_ref[0:B, 0:D] = avg
    out_ref[0:B, D:D + NUM_LABELS] = logits


# ---- wrapper ------------------------------------------------------------------
def bert_embed(input_ids, word_emb, pos_emb, ln_g, ln_b):
    # glue: embedding gather + embedding layernorm (plain JAX)
    x = jnp.take(word_emb, input_ids, axis=0) + pos_emb[None, :, :]
    mu = x.mean(-1, keepdims=True)
    var = ((x - mu) ** 2).mean(-1, keepdims=True)
    return (x - mu) * jax.lax.rsqrt(var + LN_EPS) * ln_g + ln_b


def bertamp_forward(input_ids, input_mask, params):
    (word_emb, pos_emb, emb_ln_g, emb_ln_b,
     wqkv_s, wo_s, w1_s, w2_s, pk_s,
     v1, g1, b1h, v2, g2, b2h) = params

    x = bert_embed(input_ids, word_emb, pos_emb, emb_ln_g, emb_ln_b)   # (B,S,D)
    x0 = x.reshape(B * S, D)                                           # matmul-ready 2D

    # Fused additive attention mask over the flattened token axis:
    # -inf where (query, key) are in different batches OR the key is padded.
    bidx = jnp.arange(B * S, dtype=jnp.int32) // S
    same_batch = bidx[:, None] == bidx[None, :]
    key_valid = input_mask.reshape(B * S) > 0.5
    attn_bias = jnp.where(same_batch & key_valid[None, :], 0.0, NEG_INF).astype(jnp.float32)

    # Mean-pool over seq as a (B, B*S) matmul.
    pool_mat = jnp.where(
        jnp.arange(B, dtype=jnp.int32)[:, None] == bidx[None, :],
        1.0 / S, 0.0).astype(jnp.float32)

    # weight_norm(dim=None): W = g * V / ||V||_F   (precomputed once, in wrapper)
    w1h = v1 * (g1 / jnp.sqrt(jnp.sum(v1 * v1)))                       # (D, LINSIZE)
    w2h = v2 * (g2 / jnp.sqrt(jnp.sum(v2 * v2)))                       # (LINSIZE, NUM_LABELS)
    hb = jnp.zeros((1, 128), jnp.float32)
    hb = hb.at[0, :LINSIZE].set(b1h)
    hb = hb.at[0, LINSIZE:LINSIZE + NUM_LABELS].set(b2h)

    packed = pl.pallas_call(
        bertamp_fused_kernel,
        out_shape=jax.ShapeDtypeStruct((OUT_ROWS, OUT_COLS), jnp.float32),
        grid=(1,),                                                  # single launch, single step
        in_specs=[
            pl.BlockSpec((B * S, D), lambda i: (0, 0)),             # x0
            pl.BlockSpec((B * S, B * S), lambda i: (0, 0)),         # fused attention mask
            pl.BlockSpec((B, B * S), lambda i: (0, 0)),             # pooling matrix
            pl.BlockSpec((NUM_LAYERS, D, 3 * D), lambda i: (0, 0, 0)),    # Wqkv (all layers)
            pl.BlockSpec((NUM_LAYERS, D, D), lambda i: (0, 0, 0)),        # Wo
            pl.BlockSpec((NUM_LAYERS, D, FFN), lambda i: (0, 0, 0)),      # FFN W1
            pl.BlockSpec((NUM_LAYERS, FFN, D), lambda i: (0, 0, 0)),      # FFN W2
            pl.BlockSpec((NUM_LAYERS, PK_ROWS, PK_COLS), lambda i: (0, 0, 0)),  # packed biases/LN
            pl.BlockSpec((D, LINSIZE), lambda i: (0, 0)),           # head W1 (weight-normed)
            pl.BlockSpec((LINSIZE, NUM_LABELS), lambda i: (0, 0)),  # head W2 (weight-normed)
            pl.BlockSpec((1, 128), lambda i: (0, 0)),               # head biases packed
        ],
        out_specs=pl.BlockSpec((OUT_ROWS, OUT_COLS), lambda i: (0, 0)),
        compiler_params=pltpu.CompilerParams(
            dimension_semantics=("arbitrary",)),
    )(x0, attn_bias, pool_mat, wqkv_s, wo_s, w1_s, w2_s, pk_s, w1h, w2h, hb)

    average = packed[:B, :D]
    logits = packed[:B, D:D + NUM_LABELS]
    return logits, average                                          # == (classify(avg), avg)


# ---- parameter construction (deterministic, in-script) -----------------------
def init_params(key):
    ks = iter(jax.random.split(key, 64))

    def nrm(shape, scale=0.02):
        return scale * jax.random.normal(next(ks), shape, jnp.float32)

    def xavier(shape):
        fan_in, fan_out = shape
        bound = (6.0 / (fan_in + fan_out)) ** 0.5
        return jax.random.uniform(next(ks), shape, jnp.float32, -bound, bound)

    # embeddings
    word_emb = nrm((VOCAB, D))
    pos_emb = nrm((S, D))
    emb_ln_g = jnp.ones((1, D), jnp.float32)
    emb_ln_b = jnp.zeros((1, D), jnp.float32)

    # encoder layers (stacked along a leading layer dim)
    wqkv_l, wo_l, w1_l, w2_l, pk_l = [], [], [], [], []
    for _ in range(NUM_LAYERS):
        wqkv_l.append(nrm((D, 3 * D)))
        wo_l.append(nrm((D, D)))
        w1_l.append(nrm((D, FFN)))
        w2_l.append(nrm((FFN, D)))
        pk = jnp.zeros((PK_ROWS, PK_COLS), jnp.float32)
        pk = pk.at[0, :3 * D].set(nrm((3 * D,), 0.01))   # bq|bk|bv
        pk = pk.at[1, :D].set(nrm((D,), 0.01))           # bo
        pk = pk.at[2, :D].set(jnp.ones((D,), jnp.float32))   # LN1 gamma
        pk = pk.at[3, :D].set(jnp.zeros((D,), jnp.float32))  # LN1 beta
        pk = pk.at[4, :FFN].set(nrm((FFN,), 0.01))       # FFN b1
        pk = pk.at[5, :D].set(nrm((D,), 0.01))           # FFN b2
        pk = pk.at[6, :D].set(jnp.ones((D,), jnp.float32))   # LN2 gamma
        pk = pk.at[7, :D].set(jnp.zeros((D,), jnp.float32))  # LN2 beta
        pk_l.append(pk)
    wqkv_s = jnp.stack(wqkv_l)
    wo_s = jnp.stack(wo_l)
    w1_s = jnp.stack(w1_l)
    w2_s = jnp.stack(w2_l)
    pk_s = jnp.stack(pk_l)

    # classify head: weight_norm(dim=None) Linear -> LeakyReLU -> Dropout -> weight_norm Linear
    v1 = xavier((D, LINSIZE))                 # stored (in, out)
    g1 = jnp.float32(1.5)
    b1h = nrm((LINSIZE,), 0.01)
    v2 = xavier((LINSIZE, NUM_LABELS))
    g2 = jnp.float32(0.8)
    b2h = nrm((NUM_LABELS,), 0.01)

    return (word_emb, pos_emb, emb_ln_g, emb_ln_b,
            wqkv_s, wo_s, w1_s, w2_s, pk_s,
            v1, g1, b1h, v2, g2, b2h)


if __name__ == "__main__":
    key = jax.random.PRNGKey(0)
    k_par, k_ids = jax.random.split(key)
    params = init_params(k_par)
    input_ids = jax.random.randint(k_ids, (B, S), 0, VOCAB, dtype=jnp.int32)
    input_mask = jnp.ones((B, S), jnp.float32)

    fwd = jax.jit(bertamp_forward)
    logits, average = fwd(input_ids, input_mask, params)
    jax.block_until_ready((logits, average))
    assert logits.shape == (B, NUM_LABELS) and average.shape == (B, D)
    print("KERNEL_OK")
</pallas_src>

<mosaic_0001>
module attributes {stable_mosaic.version = 11 : i64} {
  func.func @bertamp_fused_kernel(%arg0: i32, %arg1: memref<16x32xf32, #tpu.memory_space<vmem>>, %arg2: memref<16x16xf32, #tpu.memory_space<vmem>>, %arg3: memref<2x16xf32, #tpu.memory_space<vmem>>, %arg4: memref<2x32x96xf32, #tpu.memory_space<vmem>>, %arg5: memref<2x32x32xf32, #tpu.memory_space<vmem>>, %arg6: memref<2x32x64xf32, #tpu.memory_space<vmem>>, %arg7: memref<2x64x32xf32, #tpu.memory_space<vmem>>, %arg8: memref<2x8x128xf32, #tpu.memory_space<vmem>>, %arg9: memref<32x64xf32, #tpu.memory_space<vmem>>, %arg10: memref<64x2xf32, #tpu.memory_space<vmem>>, %arg11: memref<1x128xf32, #tpu.memory_space<vmem>>, %arg12: memref<8x128xf32, #tpu.memory_space<vmem>>) attributes {dimension_semantics = [#tpu.dimension_semantics<arbitrary>], iteration_bounds = array<i64: 1>, scalar_prefetch = 0 : i64, scratch_operands = 0 : i64, tpu.core_type = #tpu.core_type<tc>, window_params = [{pipeline_mode = #tpu.pipeline_mode<synchronous>, transform_indices = @transform_0, window_bounds = array<i64: 16, 32>}, {pipeline_mode = #tpu.pipeline_mode<synchronous>, transform_indices = @transform_1, window_bounds = array<i64: 16, 16>}, {pipeline_mode = #tpu.pipeline_mode<synchronous>, transform_indices = @transform_2, window_bounds = array<i64: 2, 16>}, {pipeline_mode = #tpu.pipeline_mode<synchronous>, transform_indices = @transform_3, window_bounds = array<i64: 2, 32, 96>}, {pipeline_mode = #tpu.pipeline_mode<synchronous>, transform_indices = @transform_4, window_bounds = array<i64: 2, 32, 32>}, {pipeline_mode = #tpu.pipeline_mode<synchronous>, transform_indices = @transform_5, window_bounds = array<i64: 2, 32, 64>}, {pipeline_mode = #tpu.pipeline_mode<synchronous>, transform_indices = @transform_6, window_bounds = array<i64: 2, 64, 32>}, {pipeline_mode = #tpu.pipeline_mode<synchronous>, transform_indices = @transform_7, window_bounds = array<i64: 2, 8, 128>}, {pipeline_mode = #tpu.pipeline_mode<synchronous>, transform_indices = @transform_8, window_bounds = array<i64: 32, 64>}, {pipeline_mode = #tpu.pipeline_mode<synchronous>, transform_indices = @transform_9, window_bounds = array<i64: 64, 2>}, {pipeline_mode = #tpu.pipeline_mode<synchronous>, transform_indices = @transform_10, window_bounds = array<i64: 1, 128>}, {pipeline_mode = #tpu.pipeline_mode<synchronous>, transform_indices = @transform_11, window_bounds = array<i64: 8, 128>}]} {
    %c0 = arith.constant 0 : index
    %c0_0 = arith.constant 0 : index
    %0 = vector.load %arg1[%c0, %c0_0] : memref<16x32xf32, #tpu.memory_space<vmem>>, vector<16x32xf32>
    %c0_1 = arith.constant 0 : index
    %c0_2 = arith.constant 0 : index
    %1 = vector.load %arg2[%c0_1, %c0_2] : memref<16x16xf32, #tpu.memory_space<vmem>>, vector<16x16xf32>
    %c0_3 = arith.constant 0 : index
    %c0_4 = arith.constant 0 : index
    %c0_5 = arith.constant 0 : index
    %2 = vector.load %arg8[%c0_3, %c0_4, %c0_5] : memref<2x8x128xf32, #tpu.memory_space<vmem>>, vector<1x8x128xf32>
    %3 = vector.shape_cast %2 : vector<1x8x128xf32> to vector<8x128xf32>
    %4 = vector.extract_strided_slice %3 {offsets = [0, 0], sizes = [1, 96], strides = [1, 1]} : vector<8x128xf32> to vector<1x96xf32>
    %5 = vector.extract_strided_slice %3 {offsets = [1, 0], sizes = [1, 32], strides = [1, 1]} : vector<8x128xf32> to vector<1x32xf32>
    %6 = vector.extract_strided_slice %3 {offsets = [2, 0], sizes = [1, 32], strides = [1, 1]} : vector<8x128xf32> to vector<1x32xf32>
    %7 = vector.extract_strided_slice %3 {offsets = [3, 0], sizes = [1, 32], strides = [1, 1]} : vector<8x128xf32> to vector<1x32xf32>
    %8 = vector.extract_strided_slice %3 {offsets = [4, 0], sizes = [1, 64], strides = [1, 1]} : vector<8x128xf32> to vector<1x64xf32>
    %9 = vector.extract_strided_slice %3 {offsets = [5, 0], sizes = [1, 32], strides = [1, 1]} : vector<8x128xf32> to vector<1x32xf32>
    %10 = vector.extract_strided_slice %3 {offsets = [6, 0], sizes = [1, 32], strides = [1, 1]} : vector<8x128xf32> to vector<1x32xf32>
    %11 = vector.extract_strided_slice %3 {offsets = [7, 0], sizes = [1, 32], strides = [1, 1]} : vector<8x128xf32> to vector<1x32xf32>
    %c0_6 = arith.constant 0 : index
    %c0_7 = arith.constant 0 : index
    %c0_8 = arith.constant 0 : index
    %12 = vector.load %arg5[%c0_6, %c0_7, %c0_8] : memref<2x32x32xf32, #tpu.memory_space<vmem>>, vector<1x32x32xf32>
    %13 = vector.shape_cast %12 : vector<1x32x32xf32> to vector<32x32xf32>
    %c0_9 = arith.constant 0 : index
    %c0_10 = arith.constant 0 : index
    %c0_11 = arith.constant 0 : index
    %14 = vector.load %arg4[%c0_9, %c0_10, %c0_11] : memref<2x32x96xf32, #tpu.memory_space<vmem>>, vector<1x32x96xf32>
    %15 = vector.shape_cast %14 : vector<1x32x96xf32> to vector<32x96xf32>
    %cst = arith.constant dense<0.000000e+00> : vector<16x96xf32>
    %16 = tpu.matmul %0, %15, %cst {dimension_numbers = #tpu.dot_dimension_numbers<[1], [0], [0], [1], [0, 0, 1, 1], [], []>} : vector<16x32xf32>, vector<32x96xf32>, vector<16x96xf32> -> vector<16x96xf32>
    %17 = vector.broadcast %4 : vector<1x96xf32> to vector<16x96xf32>
    %18 = arith.addf %16, %17 : vector<16x96xf32>
    %cst_12 = arith.constant 0.000000e+00 : f32
    %19 = vector.broadcast %cst_12 : f32 to vector<16x32xf32>
    %20 = vector.extract_strided_slice %18 {offsets = [0, 0], sizes = [16, 16], strides = [1, 1]} : vector<16x96xf32> to vector<16x16xf32>
    %21 = vector.extract_strided_slice %18 {offsets = [0, 32], sizes = [16, 16], strides = [1, 1]} : vector<16x96xf32> to vector<16x16xf32>
    %22 = vector.extract_strided_slice %18 {offsets = [0, 64], sizes = [16, 16], strides = [1, 1]} : vector<16x96xf32> to vector<16x16xf32>
    %cst_13 = arith.constant dense<0.000000e+00> : vector<16x16xf32>
    %23 = tpu.matmul %20, %21, %cst_13 {dimension_numbers = #tpu.dot_dimension_numbers<[1], [1], [0], [0], [0, 0, 1, 0], [], []>} : vector<16x16xf32>, vector<16x16xf32>, vector<16x16xf32> -> vector<16x16xf32>
    %cst_14 = arith.constant 2.500000e-01 : f32
    %24 = vector.broadcast %cst_14 : f32 to vector<16x16xf32>
    %25 = arith.mulf %23, %24 : vector<16x16xf32>
    %26 = arith.addf %25, %1 : vector<16x16xf32>
    %cst_15 = arith.constant dense<0xFF800000> : vector<16xf32>
    %27 = vector.multi_reduction <maximumf>, %26, %cst_15 [1] : vector<16x16xf32> to vector<16xf32>
    %28 = vector.shape_cast %27 : vector<16xf32> to vector<16x1xf32>
    %29 = vector.broadcast %28 : vector<16x1xf32> to vector<16x16xf32>
    %30 = arith.subf %26, %29 : vector<16x16xf32>
    %31 = math.exp %30 : vector<16x16xf32>
    %cst_16 = arith.constant dense<0.000000e+00> : vector<16xf32>
    %32 = vector.multi_reduction <add>, %31, %cst_16 [1] : vector<16x16xf32> to vector<16xf32>
    %33 = vector.shape_cast %32 : vector<16xf32> to vector<16x1xf32>
    %34 = tpu.reciprocal %33 {approx = true} : vector<16x1xf32> -> vector<16x1xf32>
    %35 = vector.broadcast %34 : vector<16x1xf32> to vector<16x16xf32>
    %36 = arith.mulf %31, %35 : vector<16x16xf32>
    %cst_17 = arith.constant dense<0.000000e+00> : vector<16x16xf32>
    %37 = tpu.matmul %36, %22, %cst_17 {dimension_numbers = #tpu.dot_dimension_numbers<[1], [0], [0], [1], [0, 0, 1, 1], [], []>} : vector<16x16xf32>, vector<16x16xf32>, vector<16x16xf32> -> vector<16x16xf32>
    %38 = vector.extract_strided_slice %13 {offsets = [0, 0], sizes = [16, 32], strides = [1, 1]} : vector<32x32xf32> to vector<16x32xf32>
    %cst_18 = arith.constant dense<0.000000e+00> : vector<16x32xf32>
    %39 = tpu.matmul %37, %38, %cst_18 {dimension_numbers = #tpu.dot_dimension_numbers<[1], [0], [0], [1], [0, 0, 1, 1], [], []>} : vector<16x16xf32>, vector<16x32xf32>, vector<16x32xf32> -> vector<16x32xf32>
    %40 = arith.addf %19, %39 : vector<16x32xf32>
    %41 = vector.extract_strided_slice %18 {offsets = [0, 16], sizes = [16, 16], strides = [1, 1]} : vector<16x96xf32> to vector<16x16xf32>
    %42 = vector.extract_strided_slice %18 {offsets = [0, 48], sizes = [16, 16], strides = [1, 1]} : vector<16x96xf32> to vector<16x16xf32>
    %43 = vector.extract_strided_slice %18 {offsets = [0, 80], sizes = [16, 16], strides = [1, 1]} : vector<16x96xf32> to vector<16x16xf32>
    %cst_19 = arith.constant dense<0.000000e+00> : vector<16x16xf32>
    %44 = tpu.matmul %41, %42, %cst_19 {dimension_numbers = #tpu.dot_dimension_numbers<[1], [1], [0], [0], [0, 0, 1, 0], [], []>} : vector<16x16xf32>, vector<16x16xf32>, vector<16x16xf32> -> vector<16x16xf32>
    %cst_20 = arith.constant 2.500000e-01 : f32
    %45 = vector.broadcast %cst_20 : f32 to vector<16x16xf32>
    %46 = arith.mulf %44, %45 : vector<16x16xf32>
    %47 = arith.addf %46, %1 : vector<16x16xf32>
    %cst_21 = arith.constant dense<0xFF800000> : vector<16xf32>
    %48 = vector.multi_reduction <maximumf>, %47, %cst_21 [1] : vector<16x16xf32> to vector<16xf32>
    %49 = vector.shape_cast %48 : vector<16xf32> to vector<16x1xf32>
    %50 = vector.broadcast %49 : vector<16x1xf32> to vector<16x16xf32>
    %51 = arith.subf %47, %50 : vector<16x16xf32>
    %52 = math.exp %51 : vector<16x16xf32>
    %cst_22 = arith.constant dense<0.000000e+00> : vector<16xf32>
    %53 = vector.multi_reduction <add>, %52, %cst_22 [1] : vector<16x16xf32> to vector<16xf32>
    %54 = vector.shape_cast %53 : vector<16xf32> to vector<16x1xf32>
    %55 = tpu.reciprocal %54 {approx = true} : vector<16x1xf32> -> vector<16x1xf32>
    %56 = vector.broadcast %55 : vector<16x1xf32> to vector<16x16xf32>
    %57 = arith.mulf %52, %56 : vector<16x16xf32>
    %cst_23 = arith.constant dense<0.000000e+00> : vector<16x16xf32>
    %58 = tpu.matmul %57, %43, %cst_23 {dimension_numbers = #tpu.dot_dimension_numbers<[1], [0], [0], [1], [0, 0, 1, 1], [], []>} : vector<16x16xf32>, vector<16x16xf32>, vector<16x16xf32> -> vector<16x16xf32>
    %59 = vector.extract_strided_slice %13 {offsets = [16, 0], sizes = [16, 32], strides = [1, 1]} : vector<32x32xf32> to vector<16x32xf32>
    %cst_24 = arith.constant dense<0.000000e+00> : vector<16x32xf32>
    %60 = tpu.matmul %58, %59, %cst_24 {dimension_numbers = #tpu.dot_dimension_numbers<[1], [0], [0], [1], [0, 0, 1, 1], [], []>} : vector<16x16xf32>, vector<16x32xf32>, vector<16x32xf32> -> vector<16x32xf32>
    %61 = arith.addf %40, %60 : vector<16x32xf32>
    %62 = vector.broadcast %5 : vector<1x32xf32> to vector<16x32xf32>
    %63 = arith.addf %61, %62 : vector<16x32xf32>
    %64 = arith.addf %0, %63 : vector<16x32xf32>
    %cst_25 = arith.constant dense<0.000000e+00> : vector<16xf32>
    %65 = vector.multi_reduction <add>, %64, %cst_25 [1] : vector<16x32xf32> to vector<16xf32>
    %66 = vector.shape_cast %65 : vector<16xf32> to vector<16x1xf32>
    %cst_26 = arith.constant 3.200000e+01 : f32
    %67 = vector.broadcast %cst_26 : f32 to vector<16x1xf32>
    %68 = arith.divf %66, %67 : vector<16x1xf32>
    %69 = arith.mulf %64, %64 : vector<16x32xf32>
    %cst_27 = arith.constant dense<0.000000e+00> : vector<16xf32>
    %70 = vector.multi_reduction <add>, %69, %cst_27 [1] : vector<16x32xf32> to vector<16xf32>
    %71 = vector.shape_cast %70 : vector<16xf32> to vector<16x1xf32>
    %cst_28 = arith.constant 3.200000e+01 : f32
    %72 = vector.broadcast %cst_28 : f32 to vector<16x1xf32>
    %73 = arith.divf %71, %72 : vector<16x1xf32>
    %74 = arith.mulf %68, %68 : vector<16x1xf32>
    %75 = arith.subf %73, %74 : vector<16x1xf32>
    %cst_29 = arith.constant 0.000000e+00 : f32
    %76 = vector.broadcast %cst_29 : f32 to vector<16x1xf32>
    %77 = arith.maximumf %75, %76 : vector<16x1xf32>
    %78 = vector.broadcast %68 : vector<16x1xf32> to vector<16x32xf32>
    %79 = arith.subf %64, %78 : vector<16x32xf32>
    %cst_30 = arith.constant 9.99999996E-13 : f32
    %80 = vector.broadcast %cst_30 : f32 to vector<16x1xf32>
    %81 = arith.addf %77, %80 : vector<16x1xf32>
    %82 = math.rsqrt %81 : vector<16x1xf32>
    %83 = vector.broadcast %82 : vector<16x1xf32> to vector<16x32xf32>
    %84 = arith.mulf %79, %83 : vector<16x32xf32>
    %85 = vector.broadcast %6 : vector<1x32xf32> to vector<16x32xf32>
    %86 = arith.mulf %84, %85 : vector<16x32xf32>
    %87 = vector.broadcast %7 : vector<1x32xf32> to vector<16x32xf32>
    %88 = arith.addf %86, %87 : vector<16x32xf32>
    %c0_31 = arith.constant 0 : index
    %c0_32 = arith.constant 0 : index
    %c0_33 = arith.constant 0 : index
    %89 = vector.load %arg6[%c0_31, %c0_32, %c0_33] : memref<2x32x64xf32, #tpu.memory_space<vmem>>, vector<1x32x64xf32>
    %90 = vector.shape_cast %89 : vector<1x32x64xf32> to vector<32x64xf32>
    %cst_34 = arith.constant dense<0.000000e+00> : vector<16x64xf32>
    %91 = tpu.matmul %88, %90, %cst_34 {dimension_numbers = #tpu.dot_dimension_numbers<[1], [0], [0], [1], [0, 0, 1, 1], [], []>} : vector<16x32xf32>, vector<32x64xf32>, vector<16x64xf32> -> vector<16x64xf32>
    %92 = vector.broadcast %8 : vector<1x64xf32> to vector<16x64xf32>
    %93 = arith.addf %91, %92 : vector<16x64xf32>
    %94 = arith.mulf %93, %93 : vector<16x64xf32>
    %cst_35 = arith.constant 5.000000e-01 : f32
    %95 = vector.broadcast %cst_35 : f32 to vector<16x64xf32>
    %96 = arith.mulf %95, %93 : vector<16x64xf32>
    %cst_36 = arith.constant 4.471500e-02 : f32
    %97 = vector.broadcast %cst_36 : f32 to vector<16x64xf32>
    %98 = arith.mulf %97, %93 : vector<16x64xf32>
    %99 = arith.mulf %98, %94 : vector<16x64xf32>
    %100 = arith.addf %93, %99 : vector<16x64xf32>
    %cst_37 = arith.constant 0.797884583 : f32
    %101 = vector.broadcast %cst_37 : f32 to vector<16x64xf32>
    %102 = arith.mulf %101, %100 : vector<16x64xf32>
    %103 = math.tanh %102 : vector<16x64xf32>
    %cst_38 = arith.constant 1.000000e+00 : f32
    %104 = vector.broadcast %cst_38 : f32 to vector<16x64xf32>
    %105 = arith.addf %104, %103 : vector<16x64xf32>
    %106 = arith.mulf %96, %105 : vector<16x64xf32>
    %c0_39 = arith.constant 0 : index
    %c0_40 = arith.constant 0 : index
    %c0_41 = arith.constant 0 : index
    %107 = vector.load %arg7[%c0_39, %c0_40, %c0_41] : memref<2x64x32xf32, #tpu.memory_space<vmem>>, vector<1x64x32xf32>
    %108 = vector.shape_cast %107 : vector<1x64x32xf32> to vector<64x32xf32>
    %cst_42 = arith.constant dense<0.000000e+00> : vector<16x32xf32>
    %109 = tpu.matmul %106, %108, %cst_42 {dimension_numbers = #tpu.dot_dimension_numbers<[1], [0], [0], [1], [0, 0, 1, 1], [], []>} : vector<16x64xf32>, vector<64x32xf32>, vector<16x32xf32> -> vector<16x32xf32>
    %110 = vector.broadcast %9 : vector<1x32xf32> to vector<16x32xf32>
    %111 = arith.addf %109, %110 : vector<16x32xf32>
    %112 = arith.addf %88, %111 : vector<16x32xf32>
    %cst_43 = arith.constant dense<0.000000e+00> : vector<16xf32>
    %113 = vector.multi_reduction <add>, %112, %cst_43 [1] : vector<16x32xf32> to vector<16xf32>
    %114 = vector.shape_cast %113 : vector<16xf32> to vector<16x1xf32>
    %cst_44 = arith.constant 3.200000e+01 : f32
    %115 = vector.broadcast %cst_44 : f32 to vector<16x1xf32>
    %116 = arith.divf %114, %115 : vector<16x1xf32>
    %117 = arith.mulf %112, %112 : vector<16x32xf32>
    %cst_45 = arith.constant dense<0.000000e+00> : vector<16xf32>
    %118 = vector.multi_reduction <add>, %117, %cst_45 [1] : vector<16x32xf32> to vector<16xf32>
    %119 = vector.shape_cast %118 : vector<16xf32> to vector<16x1xf32>
    %cst_46 = arith.constant 3.200000e+01 : f32
    %120 = vector.broadcast %cst_46 : f32 to vector<16x1xf32>
    %121 = arith.divf %119, %120 : vector<16x1xf32>
    %122 = arith.mulf %116, %116 : vector<16x1xf32>
    %123 = arith.subf %121, %122 : vector<16x1xf32>
    %cst_47 = arith.constant 0.000000e+00 : f32
    %124 = vector.broadcast %cst_47 : f32 to vector<16x1xf32>
    %125 = arith.maximumf %123, %124 : vector<16x1xf32>
    %126 = vector.broadcast %116 : vector<16x1xf32> to vector<16x32xf32>
    %127 = arith.subf %112, %126 : vector<16x32xf32>
    %cst_48 = arith.constant 9.99999996E-13 : f32
    %128 = vector.broadcast %cst_48 : f32 to vector<16x1xf32>
    %129 = arith.addf %125, %128 : vector<16x1xf32>
    %130 = math.rsqrt %129 : vector<16x1xf32>
    %131 = vector.broadcast %130 : vector<16x1xf32> to vector<16x32xf32>
    %132 = arith.mulf %127, %131 : vector<16x32xf32>
    %133 = vector.broadcast %10 : vector<1x32xf32> to vector<16x32xf32>
    %134 = arith.mulf %132, %133 : vector<16x32xf32>
    %135 = vector.broadcast %11 : vector<1x32xf32> to vector<16x32xf32>
    %136 = arith.addf %134, %135 : vector<16x32xf32>
    %c1 = arith.constant 1 : index
    %c0_49 = arith.constant 0 : index
    %c0_50 = arith.constant 0 : index
    %137 = vector.load %arg8[%c1, %c0_49, %c0_50] : memref<2x8x128xf32, #tpu.memory_space<vmem>>, vector<1x8x128xf32>
    %138 = vector.shape_cast %137 : vector<1x8x128xf32> to vector<8x128xf32>
    %139 = vector.extract_strided_slice %138 {offsets = [0, 0], sizes = [1, 96], strides = [1, 1]} : vector<8x128xf32> to vector<1x96xf32>
    %140 = vector.extract_strided_slice %138 {offsets = [1, 0], sizes = [1, 32], strides = [1, 1]} : vector<8x128xf32> to vector<1x32xf32>
    %141 = vector.extract_strided_slice %138 {offsets = [2, 0], sizes = [1, 32], strides = [1, 1]} : vector<8x128xf32> to vector<1x32xf32>
    %142 = vector.extract_strided_slice %138 {offsets = [3, 0], sizes = [1, 32], strides = [1, 1]} : vector<8x128xf32> to vector<1x32xf32>
    %143 = vector.extract_strided_slice %138 {offsets = [4, 0], sizes = [1, 64], strides = [1, 1]} : vector<8x128xf32> to vector<1x64xf32>
    %144 = vector.extract_strided_slice %138 {offsets = [5, 0], sizes = [1, 32], strides = [1, 1]} : vector<8x128xf32> to vector<1x32xf32>
    %145 = vector.extract_strided_slice %138 {offsets = [6, 0], sizes = [1, 32], strides = [1, 1]} : vector<8x128xf32> to vector<1x32xf32>
    %146 = vector.extract_strided_slice %138 {offsets = [7, 0], sizes = [1, 32], strides = [1, 1]} : vector<8x128xf32> to vector<1x32xf32>
    %c1_51 = arith.constant 1 : index
    %c0_52 = arith.constant 0 : index
    %c0_53 = arith.constant 0 : index
    %147 = vector.load %arg5[%c1_51, %c0_52, %c0_53] : memref<2x32x32xf32, #tpu.memory_space<vmem>>, vector<1x32x32xf32>
    %148 = vector.shape_cast %147 : vector<1x32x32xf32> to vector<32x32xf32>
    %c1_54 = arith.constant 1 : index
    %c0_55 = arith.constant 0 : index
    %c0_56 = arith.constant 0 : index
    %149 = vector.load %arg4[%c1_54, %c0_55, %c0_56] : memref<2x32x96xf32, #tpu.memory_space<vmem>>, vector<1x32x96xf32>
    %150 = vector.shape_cast %149 : vector<1x32x96xf32> to vector<32x96xf32>
    %cst_57 = arith.constant dense<0.000000e+00> : vector<16x96xf32>
    %151 = tpu.matmul %136, %150, %cst_57 {dimension_numbers = #tpu.dot_dimension_numbers<[1], [0], [0], [1], [0, 0, 1, 1], [], []>} : vector<16x32xf32>, vector<32x96xf32>, vector<16x96xf32> -> vector<16x96xf32>
    %152 = vector.broadcast %139 : vector<1x96xf32> to vector<16x96xf32>
    %153 = arith.addf %151, %152 : vector<16x96xf32>
    %cst_58 = arith.constant 0.000000e+00 : f32
    %154 = vector.broadcast %cst_58 : f32 to vector<16x32xf32>
    %155 = vector.extract_strided_slice %153 {offsets = [0, 0], sizes = [16, 16], strides = [1, 1]} : vector<16x96xf32> to vector<16x16xf32>
    %156 = vector.extract_strided_slice %153 {offsets = [0, 32], sizes = [16, 16], strides = [1, 1]} : vector<16x96xf32> to vector<16x16xf32>
    %157 = vector.extract_strided_slice %153 {offsets = [0, 64], sizes = [16, 16], strides = [1, 1]} : vector<16x96xf32> to vector<16x16xf32>
    %cst_59 = arith.constant dense<0.000000e+00> : vector<16x16xf32>
    %158 = tpu.matmul %155, %156, %cst_59 {dimension_numbers = #tpu.dot_dimension_numbers<[1], [1], [0], [0], [0, 0, 1, 0], [], []>} : vector<16x16xf32>, vector<16x16xf32>, vector<16x16xf32> -> vector<16x16xf32>
    %cst_60 = arith.constant 2.500000e-01 : f32
    %159 = vector.broadcast %cst_60 : f32 to vector<16x16xf32>
    %160 = arith.mulf %158, %159 : vector<16x16xf32>
    %161 = arith.addf %160, %1 : vector<16x16xf32>
    %cst_61 = arith.constant dense<0xFF800000> : vector<16xf32>
    %162 = vector.multi_reduction <maximumf>, %161, %cst_61 [1] : vector<16x16xf32> to vector<16xf32>
    %163 = vector.shape_cast %162 : vector<16xf32> to vector<16x1xf32>
    %164 = vector.broadcast %163 : vector<16x1xf32> to vector<16x16xf32>
    %165 = arith.subf %161, %164 : vector<16x16xf32>
    %166 = math.exp %165 : vector<16x16xf32>
    %cst_62 = arith.constant dense<0.000000e+00> : vector<16xf32>
    %167 = vector.multi_reduction <add>, %166, %cst_62 [1] : vector<16x16xf32> to vector<16xf32>
    %168 = vector.shape_cast %167 : vector<16xf32> to vector<16x1xf32>
    %169 = tpu.reciprocal %168 {approx = true} : vector<16x1xf32> -> vector<16x1xf32>
    %170 = vector.broadcast %169 : vector<16x1xf32> to vector<16x16xf32>
    %171 = arith.mulf %166, %170 : vector<16x16xf32>
    %cst_63 = arith.constant dense<0.000000e+00> : vector<16x16xf32>
    %172 = tpu.matmul %171, %157, %cst_63 {dimension_numbers = #tpu.dot_dimension_numbers<[1], [0], [0], [1], [0, 0, 1, 1], [], []>} : vector<16x16xf32>, vector<16x16xf32>, vector<16x16xf32> -> vector<16x16xf32>
    %173 = vector.extract_strided_slice %148 {offsets = [0, 0], sizes = [16, 32], strides = [1, 1]} : vector<32x32xf32> to vector<16x32xf32>
    %cst_64 = arith.constant dense<0.000000e+00> : vector<16x32xf32>
    %174 = tpu.matmul %172, %173, %cst_64 {dimension_numbers = #tpu.dot_dimension_numbers<[1], [0], [0], [1], [0, 0, 1, 1], [], []>} : vector<16x16xf32>, vector<16x32xf32>, vector<16x32xf32> -> vector<16x32xf32>
    %175 = arith.addf %154, %174 : vector<16x32xf32>
    %176 = vector.extract_strided_slice %153 {offsets = [0, 16], sizes = [16, 16], strides = [1, 1]} : vector<16x96xf32> to vector<16x16xf32>
    %177 = vector.extract_strided_slice %153 {offsets = [0, 48], sizes = [16, 16], strides = [1, 1]} : vector<16x96xf32> to vector<16x16xf32>
    %178 = vector.extract_strided_slice %153 {offsets = [0, 80], sizes = [16, 16], strides = [1, 1]} : vector<16x96xf32> to vector<16x16xf32>
    %cst_65 = arith.constant dense<0.000000e+00> : vector<16x16xf32>
    %179 = tpu.matmul %176, %177, %cst_65 {dimension_numbers = #tpu.dot_dimension_numbers<[1], [1], [0], [0], [0, 0, 1, 0], [], []>} : vector<16x16xf32>, vector<16x16xf32>, vector<16x16xf32> -> vector<16x16xf32>
    %cst_66 = arith.constant 2.500000e-01 : f32
    %180 = vector.broadcast %cst_66 : f32 to vector<16x16xf32>
    %181 = arith.mulf %179, %180 : vector<16x16xf32>
    %182 = arith.addf %181, %1 : vector<16x16xf32>
    %cst_67 = arith.constant dense<0xFF800000> : vector<16xf32>
    %183 = vector.multi_reduction <maximumf>, %182, %cst_67 [1] : vector<16x16xf32> to vector<16xf32>
    %184 = vector.shape_cast %183 : vector<16xf32> to vector<16x1xf32>
    %185 = vector.broadcast %184 : vector<16x1xf32> to vector<16x16xf32>
    %186 = arith.subf %182, %185 : vector<16x16xf32>
    %187 = math.exp %186 : vector<16x16xf32>
    %cst_68 = arith.constant dense<0.000000e+00> : vector<16xf32>
    %188 = vector.multi_reduction <add>, %187, %cst_68 [1] : vector<16x16xf32> to vector<16xf32>
    %189 = vector.shape_cast %188 : vector<16xf32> to vector<16x1xf32>
    %190 = tpu.reciprocal %189 {approx = true} : vector<16x1xf32> -> vector<16x1xf32>
    %191 = vector.broadcast %190 : vector<16x1xf32> to vector<16x16xf32>
    %192 = arith.mulf %187, %191 : vector<16x16xf32>
    %cst_69 = arith.constant dense<0.000000e+00> : vector<16x16xf32>
    %193 = tpu.matmul %192, %178, %cst_69 {dimension_numbers = #tpu.dot_dimension_numbers<[1], [0], [0], [1], [0, 0, 1, 1], [], []>} : vector<16x16xf32>, vector<16x16xf32>, vector<16x16xf32> -> vector<16x16xf32>
    %194 = vector.extract_strided_slice %148 {offsets = [16, 0], sizes = [16, 32], strides = [1, 1]} : vector<32x32xf32> to vector<16x32xf32>
    %cst_70 = arith.constant dense<0.000000e+00> : vector<16x32xf32>
    %195 = tpu.matmul %193, %194, %cst_70 {dimension_numbers = #tpu.dot_dimension_numbers<[1], [0], [0], [1], [0, 0, 1, 1], [], []>} : vector<16x16xf32>, vector<16x32xf32>, vector<16x32xf32> -> vector<16x32xf32>
    %196 = arith.addf %175, %195 : vector<16x32xf32>
    %197 = vector.broadcast %140 : vector<1x32xf32> to vector<16x32xf32>
    %198 = arith.addf %196, %197 : vector<16x32xf32>
    %199 = arith.addf %136, %198 : vector<16x32xf32>
    %cst_71 = arith.constant dense<0.000000e+00> : vector<16xf32>
    %200 = vector.multi_reduction <add>, %199, %cst_71 [1] : vector<16x32xf32> to vector<16xf32>
    %201 = vector.shape_cast %200 : vector<16xf32> to vector<16x1xf32>
    %cst_72 = arith.constant 3.200000e+01 : f32
    %202 = vector.broadcast %cst_72 : f32 to vector<16x1xf32>
    %203 = arith.divf %201, %202 : vector<16x1xf32>
    %204 = arith.mulf %199, %199 : vector<16x32xf32>
    %cst_73 = arith.constant dense<0.000000e+00> : vector<16xf32>
    %205 = vector.multi_reduction <add>, %204, %cst_73 [1] : vector<16x32xf32> to vector<16xf32>
    %206 = vector.shape_cast %205 : vector<16xf32> to vector<16x1xf32>
    %cst_74 = arith.constant 3.200000e+01 : f32
    %207 = vector.broadcast %cst_74 : f32 to vector<16x1xf32>
    %208 = arith.divf %206, %207 : vector<16x1xf32>
    %209 = arith.mulf %203, %203 : vector<16x1xf32>
    %210 = arith.subf %208, %209 : vector<16x1xf32>
    %cst_75 = arith.constant 0.000000e+00 : f32
    %211 = vector.broadcast %cst_75 : f32 to vector<16x1xf32>
    %212 = arith.maximumf %210, %211 : vector<16x1xf32>
    %213 = vector.broadcast %203 : vector<16x1xf32> to vector<16x32xf32>
    %214 = arith.subf %199, %213 : vector<16x32xf32>
    %cst_76 = arith.constant 9.99999996E-13 : f32
    %215 = vector.broadcast %cst_76 : f32 to vector<16x1xf32>
    %216 = arith.addf %212, %215 : vector<16x1xf32>
    %217 = math.rsqrt %216 : vector<16x1xf32>
    %218 = vector.broadcast %217 : vector<16x1xf32> to vector<16x32xf32>
    %219 = arith.mulf %214, %218 : vector<16x32xf32>
    %220 = vector.broadcast %141 : vector<1x32xf32> to vector<16x32xf32>
    %221 = arith.mulf %219, %220 : vector<16x32xf32>
    %222 = vector.broadcast %142 : vector<1x32xf32> to vector<16x32xf32>
    %223 = arith.addf %221, %222 : vector<16x32xf32>
    %c1_77 = arith.constant 1 : index
    %c0_78 = arith.constant 0 : index
    %c0_79 = arith.constant 0 : index
    %224 = vector.load %arg6[%c1_77, %c0_78, %c0_79] : memref<2x32x64xf32, #tpu.memory_space<vmem>>, vector<1x32x64xf32>
    %225 = vector.shape_cast %224 : vector<1x32x64xf32> to vector<32x64xf32>
    %cst_80 = arith.constant dense<0.000000e+00> : vector<16x64xf32>
    %226 = tpu.matmul %223, %225, %cst_80 {dimension_numbers = #tpu.dot_dimension_numbers<[1], [0], [0], [1], [0, 0, 1, 1], [], []>} : vector<16x32xf32>, vector<32x64xf32>, vector<16x64xf32> -> vector<16x64xf32>
    %227 = vector.broadcast %143 : vector<1x64xf32> to vector<16x64xf32>
    %228 = arith.addf %226, %227 : vector<16x64xf32>
    %229 = arith.mulf %228, %228 : vector<16x64xf32>
    %cst_81 = arith.constant 5.000000e-01 : f32
    %230 = vector.broadcast %cst_81 : f32 to vector<16x64xf32>
    %231 = arith.mulf %230, %228 : vector<16x64xf32>
    %cst_82 = arith.constant 4.471500e-02 : f32
    %232 = vector.broadcast %cst_82 : f32 to vector<16x64xf32>
    %233 = arith.mulf %232, %228 : vector<16x64xf32>
    %234 = arith.mulf %233, %229 : vector<16x64xf32>
    %235 = arith.addf %228, %234 : vector<16x64xf32>
    %cst_83 = arith.constant 0.797884583 : f32
    %236 = vector.broadcast %cst_83 : f32 to vector<16x64xf32>
    %237 = arith.mulf %236, %235 : vector<16x64xf32>
    %238 = math.tanh %237 : vector<16x64xf32>
    %cst_84 = arith.constant 1.000000e+00 : f32
    %239 = vector.broadcast %cst_84 : f32 to vector<16x64xf32>
    %240 = arith.addf %239, %238 : vector<16x64xf32>
    %241 = arith.mulf %231, %240 : vector<16x64xf32>
    %c1_85 = arith.constant 1 : index
    %c0_86 = arith.constant 0 : index
    %c0_87 = arith.constant 0 : index
    %242 = vector.load %arg7[%c1_85, %c0_86, %c0_87] : memref<2x64x32xf32, #tpu.memory_space<vmem>>, vector<1x64x32xf32>
    %243 = vector.shape_cast %242 : vector<1x64x32xf32> to vector<64x32xf32>
    %cst_88 = arith.constant dense<0.000000e+00> : vector<16x32xf32>
    %244 = tpu.matmul %241, %243, %cst_88 {dimension_numbers = #tpu.dot_dimension_numbers<[1], [0], [0], [1], [0, 0, 1, 1], [], []>} : vector<16x64xf32>, vector<64x32xf32>, vector<16x32xf32> -> vector<16x32xf32>
    %245 = vector.broadcast %144 : vector<1x32xf32> to vector<16x32xf32>
    %246 = arith.addf %244, %245 : vector<16x32xf32>
    %247 = arith.addf %223, %246 : vector<16x32xf32>
    %cst_89 = arith.constant dense<0.000000e+00> : vector<16xf32>
    %248 = vector.multi_reduction <add>, %247, %cst_89 [1] : vector<16x32xf32> to vector<16xf32>
    %249 = vector.shape_cast %248 : vector<16xf32> to vector<16x1xf32>
    %cst_90 = arith.constant 3.200000e+01 : f32
    %250 = vector.broadcast %cst_90 : f32 to vector<16x1xf32>
    %251 = arith.divf %249, %250 : vector<16x1xf32>
    %252 = arith.mulf %247, %247 : vector<16x32xf32>
    %cst_91 = arith.constant dense<0.000000e+00> : vector<16xf32>
    %253 = vector.multi_reduction <add>, %252, %cst_91 [1] : vector<16x32xf32> to vector<16xf32>
    %254 = vector.shape_cast %253 : vector<16xf32> to vector<16x1xf32>
    %cst_92 = arith.constant 3.200000e+01 : f32
    %255 = vector.broadcast %cst_92 : f32 to vector<16x1xf32>
    %256 = arith.divf %254, %255 : vector<16x1xf32>
    %257 = arith.mulf %251, %251 : vector<16x1xf32>
    %258 = arith.subf %256, %257 : vector<16x1xf32>
    %cst_93 = arith.constant 0.000000e+00 : f32
    %259 = vector.broadcast %cst_93 : f32 to vector<16x1xf32>
    %260 = arith.maximumf %258, %259 : vector<16x1xf32>
    %261 = vector.broadcast %251 : vector<16x1xf32> to vector<16x32xf32>
    %262 = arith.subf %247, %261 : vector<16x32xf32>
    %cst_94 = arith.constant 9.99999996E-13 : f32
    %263 = vector.broadcast %cst_94 : f32 to vector<16x1xf32>
    %264 = arith.addf %260, %263 : vector<16x1xf32>
    %265 = math.rsqrt %264 : vector<16x1xf32>
    %266 = vector.broadcast %265 : vector<16x1xf32> to vector<16x32xf32>
    %267 = arith.mulf %262, %266 : vector<16x32xf32>
    %268 = vector.broadcast %145 : vector<1x32xf32> to vector<16x32xf32>
    %269 = arith.mulf %267, %268 : vector<16x32xf32>
    %270 = vector.broadcast %146 : vector<1x32xf32> to vector<16x32xf32>
    %271 = arith.addf %269, %270 : vector<16x32xf32>
    %c0_95 = arith.constant 0 : index
    %c0_96 = arith.constant 0 : index
    %272 = vector.load %arg3[%c0_95, %c0_96] : memref<2x16xf32, #tpu.memory_space<vmem>>, vector<2x16xf32>
    %cst_97 = arith.constant dense<0.000000e+00> : vector<2x32xf32>
    %273 = tpu.matmul %272, %271, %cst_97 {dimension_numbers = #tpu.dot_dimension_numbers<[1], [0], [0], [1], [0, 0, 1, 1], [], []>} : vector<2x16xf32>, vector<16x32xf32>, vector<2x32xf32> -> vector<2x32xf32>
    %c0_98 = arith.constant 0 : index
    %c0_99 = arith.constant 0 : index
    %274 = vector.load %arg11[%c0_98, %c0_99] : memref<1x128xf32, #tpu.memory_space<vmem>>, vector<1x128xf32>
    %275 = vector.extract_strided_slice %274 {offsets = [0, 0], sizes = [1, 64], strides = [1, 1]} : vector<1x128xf32> to vector<1x64xf32>
    %276 = vector.extract_strided_slice %274 {offsets = [0, 64], sizes = [1, 2], strides = [1, 1]} : vector<1x128xf32> to vector<1x2xf32>
    %c0_100 = arith.constant 0 : index
    %c0_101 = arith.constant 0 : index
    %277 = vector.load %arg9[%c0_100, %c0_101] : memref<32x64xf32, #tpu.memory_space<vmem>>, vector<32x64xf32>
    %cst_102 = arith.constant dense<0.000000e+00> : vector<2x64xf32>
    %278 = tpu.matmul %273, %277, %cst_102 {dimension_numbers = #tpu.dot_dimension_numbers<[1], [0], [0], [1], [0, 0, 1, 1], [], []>} : vector<2x32xf32>, vector<32x64xf32>, vector<2x64xf32> -> vector<2x64xf32>
    %279 = vector.broadcast %275 : vector<1x64xf32> to vector<2x64xf32>
    %280 = arith.addf %278, %279 : vector<2x64xf32>
    %cst_103 = arith.constant 0.000000e+00 : f32
    %281 = vector.broadcast %cst_103 : f32 to vector<2x64xf32>
    %282 = arith.cmpf ogt, %280, %281 : vector<2x64xf32>
    %cst_104 = arith.constant 0.00999999977 : f32
    %283 = vector.broadcast %cst_104 : f32 to vector<2x64xf32>
    %284 = arith.mulf %283, %280 : vector<2x64xf32>
    %285 = arith.select %282, %280, %284 : vector<2x64xi1>, vector<2x64xf32>
    %c0_105 = arith.constant 0 : index
    %c0_106 = arith.constant 0 : index
    %286 = vector.load %arg10[%c0_105, %c0_106] : memref<64x2xf32, #tpu.memory_space<vmem>>, vector<64x2xf32>
    %cst_107 = arith.constant dense<0.000000e+00> : vector<2x2xf32>
    %287 = tpu.matmul %285, %286, %cst_107 {dimension_numbers = #tpu.dot_dimension_numbers<[1], [0], [0], [1], [0, 0, 1, 1], [], []>} : vector<2x64xf32>, vector<64x2xf32>, vector<2x2xf32> -> vector<2x2xf32>
    %288 = vector.broadcast %276 : vector<1x2xf32> to vector<2x2xf32>
    %289 = arith.addf %287, %288 : vector<2x2xf32>
    %cst_108 = arith.constant 0.000000e+00 : f32
    %290 = vector.broadcast %cst_108 : f32 to vector<8x128xf32>
    %c0_109 = arith.constant 0 : index
    %c0_110 = arith.constant 0 : index
    %291 = vector.load %arg12[%c0_109, %c0_110] : memref<8x128xf32, #tpu.memory_space<vmem>>, vector<8x128xf32>
    tpu.vector_store %arg12[%c0_109, %c0_110], %290 {strides = array<i32>} : memref<8x128xf32, #tpu.memory_space<vmem>>, vector<8x128xf32>,
    %c0_111 = arith.constant 0 : index
    %c0_112 = arith.constant 0 : index
    %292 = vector.load %arg12[%c0_111, %c0_112] : memref<8x128xf32, #tpu.memory_space<vmem>>, vector<2x32xf32>
    tpu.vector_store %arg12[%c0_111, %c0_112], %273 {strides = array<i32>} : memref<8x128xf32, #tpu.memory_space<vmem>>, vector<2x32xf32>,
    %c0_113 = arith.constant 0 : index
    %c32 = arith.constant 32 : index
    %293 = vector.load %arg12[%c0_113, %c32] : memref<8x128xf32, #tpu.memory_space<vmem>>, vector<2x2xf32>
    tpu.vector_store %arg12[%c0_113, %c32], %289 {strides = array<i32>} : memref<8x128xf32, #tpu.memory_space<vmem>>, vector<2x2xf32>,
    return
  }
  func.func @transform_0(%arg0: i32) -> (i32, i32) {
    %c0_i32 = arith.constant 0 : i32
    %c0_i32_0 = arith.constant 0 : i32
    %c0_i32_1 = arith.constant 0 : i32
    return %c0_i32, %c0_i32_0 : i32, i32
  }
  func.func @transform_1(%arg0: i32) -> (i32, i32) {
    %c0_i32 = arith.constant 0 : i32
    %c0_i32_0 = arith.constant 0 : i32
    %c0_i32_1 = arith.constant 0 : i32
    return %c0_i32, %c0_i32_0 : i32, i32
  }
  func.func @transform_2(%arg0: i32) -> (i32, i32) {
    %c0_i32 = arith.constant 0 : i32
    %c0_i32_0 = arith.constant 0 : i32
    %c0_i32_1 = arith.constant 0 : i32
    return %c0_i32, %c0_i32_0 : i32, i32
  }
  func.func @transform_3(%arg0: i32) -> (i32, i32, i32) {
    %c0_i32 = arith.constant 0 : i32
    %c0_i32_0 = arith.constant 0 : i32
    %c0_i32_1 = arith.constant 0 : i32
    %c0_i32_2 = arith.constant 0 : i32
    return %c0_i32, %c0_i32_0, %c0_i32_1 : i32, i32, i32
  }
  func.func @transform_4(%arg0: i32) -> (i32, i32, i32) {
    %c0_i32 = arith.constant 0 : i32
    %c0_i32_0 = arith.constant 0 : i32
    %c0_i32_1 = arith.constant 0 : i32
    %c0_i32_2 = arith.constant 0 : i32
    return %c0_i32, %c0_i32_0, %c0_i32_1 : i32, i32, i32
  }
  func.func @transform_5(%arg0: i32) -> (i32, i32, i32) {
    %c0_i32 = arith.constant 0 : i32
    %c0_i32_0 = arith.constant 0 : i32
    %c0_i32_1 = arith.constant 0 : i32
    %c0_i32_2 = arith.constant 0 : i32
    return %c0_i32, %c0_i32_0, %c0_i32_1 : i32, i32, i32
  }
  func.func @transform_6(%arg0: i32) -> (i32, i32, i32) {
    %c0_i32 = arith.constant 0 : i32
    %c0_i32_0 = arith.constant 0 : i32
    %c0_i32_1 = arith.constant 0 : i32
    %c0_i32_2 = arith.constant 0 : i32
    return %c0_i32, %c0_i32_0, %c0_i32_1 : i32, i32, i32
  }
  func.func @transform_7(%arg0: i32) -> (i32, i32, i32) {
    %c0_i32 = arith.constant 0 : i32
    %c0_i32_0 = arith.constant 0 : i32
    %c0_i32_1 = arith.constant 0 : i32
    %c0_i32_2 = arith.constant 0 : i32
    return %c0_i32, %c0_i32_0, %c0_i32_1 : i32, i32, i32
  }
  func.func @transform_8(%arg0: i32) -> (i32, i32) {
    %c0_i32 = arith.constant 0 : i32
    %c0_i32_0 = arith.constant 0 : i32
    %c0_i32_1 = arith.constant 0 : i32
    return %c0_i32, %c0_i32_0 : i32, i32
  }
  func.func @transform_9(%arg0: i32) -> (i32, i32) {
    %c0_i32 = arith.constant 0 : i32
    %c0_i32_0 = arith.constant 0 : i32
    %c0_i32_1 = arith.constant 0 : i32
    return %c0_i32, %c0_i32_0 : i32, i32
  }
  func.func @transform_10(%arg0: i32) -> (i32, i32) {
    %c0_i32 = arith.constant 0 : i32
    %c0_i32_0 = arith.constant 0 : i32
    %c0_i32_1 = arith.constant 0 : i32
    return %c0_i32, %c0_i32_0 : i32, i32
  }
  func.func @transform_11(%arg0: i32) -> (i32, i32) {
    %c0_i32 = arith.constant 0 : i32
    %c0_i32_0 = arith.constant 0 : i32
    %c0_i32_1 = arith.constant 0 : i32
    return %c0_i32, %c0_i32_0 : i32, i32
  }
}

</mosaic_0001>

<bundles_post_ra>
// kernel: bertamp_forward.1
= control target key start
LH: loop header
LB: loop body
LE: loop exit
PB: predicated region body
PF: predicated region fallthrough
CT: control target
= control target key end

     0   :  { %vm55_vm0 = vcmask 261120   ;;  %v51_v6 = vlaneseq  ;;  %vm143_vm1 = vcmask 130048   ;;  %s2675_s12 = smov 96   ;;  %s2676_s13 = smov 112   ;;  %vm878_vm2 = vcmask 523264   ;;  %s3178_s3 = inlined_call_operand.vmem [shape: f32[2,32,96], index: 3, kind: input, shape index: {}]   ;;  %s3179_s0 = inlined_call_operand.vmem [shape: f32[16,32], index: 0, kind: input, shape index: {}]   ;;  %s3180_s7 = inlined_call_operand.vmem [shape: f32[2,8,128], index: 7, kind: input, shape index: {}]   ;;  %s3181_s1 = inlined_call_operand.vmem [shape: f32[16,16], index: 1, kind: input, shape index: {}]   ;;  %s3182_s4 = inlined_call_operand.vmem [shape: f32[2,32,32], index: 4, kind: input, shape index: {}]   ;;  %s3183_s5 = inlined_call_operand.vmem [shape: f32[2,32,64], index: 5, kind: input, shape index: {}]   ;;  %s3184_s6 = inlined_call_operand.vmem [shape: f32[2,64,32], index: 6, kind: input, shape index: {}]   ;;  %s3185_s11 = inlined_call_operand.vmem [shape: f32[8,128], index: 11, kind: output, shape index: {}]   ;;  %s3186_s2 = inlined_call_operand.vmem [shape: f32[2,16], index: 2, kind: input, shape index: {}]   ;;  %s3187_s8 = inlined_call_operand.vmem [shape: f32[32,64], index: 8, kind: input, shape index: {}]   ;;  %s3188_s9 = inlined_call_operand.vmem [shape: f32[64,2], index: 9, kind: input, shape index: {}]   ;;  %s3189_s10 = inlined_call_operand.vmem [shape: f32[1,128], index: 10, kind: input, shape index: {}]  }
   0x1   :  { %v50_v0 = vld [vmem:[%s3178_s3 + $0x18] sm:$0xff]  ;;  %v49_v1 = vld [vmem:[%s3178_s3 + $0x10] sm:$0xff]  ;;  %v2751_v2 = vld [vmem:[%s3179_s0] sm:$0xff]  ;;  %s2678_s18 = smov 48   ;;  %vm2680_vm3 = vmmov 0   ;;  %vm2217_vm4 = vcmask 254976  }
   0x2   :  { %2407 = vmatprep.subr.mxu0 %v50_v0  ;;  %v48_v3 = vld [vmem:[%s3178_s3 + $0x8] sm:$0xff]  ;;  %2415 = vmatprep.mubr.msk.f32.mxu0 %vm55_vm0, %v2751_v2  ;;  %v47_v4 = vld [vmem:[%s3178_s3] sm:$0xff]  ;;  %v2768_v7 = vshrl.u32 %v51_v6, 7  ;;  %s2681_s15 = smov 32   ;;  %vm2223_vm6 = vcmask 271616  }
   0x3   :  { %2408 = vmatpush3.msra.mxu0 %v50_v0  ;;  %v2764_v5 = vld [vmem:[%s3179_s0 + $0x8] sm:$0xff]  ;;  %v2774_v9 = vld [vmem:[%s3180_s7] sm:$0xff]  ;;  %s2674_s0 = smov 80  }
   0x4   :  { %2409 = vmatprep.subr.mxu0 %v49_v1  ;;  %v53_v8 = vsub.s32 0, %v2768_v7  ;;  %v2806_v22 = vld [vmem:[%s3181_s1 + $0x8] sm:$0xff]  ;;  %v2811_v26 = vld [vmem:[%s3181_s1] sm:$0xff]  ;;  %s2677_s1 = smov 64  }
   0x5   :  { %2410 = vmatpush3.msra.mxu0 %v49_v1 }
   0x6   :  { %2411 = vmatprep.subr.mxu0 %v48_v3  ;;  %v54_v10 = vrot.slane %v2774_v9, %v53_v8 }
   0x7   :  { %2412 = vmatpush3.msra.mxu0 %v48_v3 }
   0x8   :  { %2413 = vmatprep.subr.mxu0 %v47_v4 }
   0x9   :  { %2414 = vmatpush3.msra.mxu0 %v47_v4 }
   0xa   :  { %2416 = vmatmul.mubr.msk.f32.vlgmr.msra.gmra.mxu0 %vm55_vm0, %v2764_v5 }
  0xca   :  { %v2417_v11 = vpop.f32.mrf.mxu0 }
  0xcb   :  { %v134_v12 = vadd.f32 %v2417_v11, %v54_v10 }
  0xcc   :  { %v128_v13 = vpop.f32.mrf.mxu0 }
  0xcd   :  { %v2779_v14 = vadd.f32 %v128_v13, %v54_v10  ;;  %346 = vrot.lane.b32.xlu1 %v134_v12, %s2674_s0  ;;  %141 = vrot.lane.b32.xlu0 %v134_v12, %s2675_s12 }
  0xcf   :  { %2422 = vmatprep.mubr.msk.f32.mxu0 %vm143_vm1, %v2779_v14 }
  0xd1   :  { %344 = vrot.lane.b32.xlu1 %v2779_v14, %s2674_s0  ;;  %139 = vrot.lane.b32.xlu0 %v2779_v14, %s2675_s12 }
  0xd5   :  { %342 = vrot.lane.b32.xlu1 %v134_v12, %s2676_s13  ;;  %340 = vrot.lane.b32.xlu0 %v2779_v14, %s2676_s13 }
 0x13f   :  { %v347_v15 = vpop.permute.xlu1 %346  ;;  %v142_v16 = vpop.permute.xlu0 %141 }
 0x140   :  { %2418 = vmatprep.subr.msk.mxu0 %vm143_vm1, %v142_v16  ;;  %2432 = vmatprep.subr.msk.mxu1 %vm143_vm1, %v347_v15 }
 0x141   :  { %2419 = vmatpush3.xpose.msk.msra.mxu0 %vm143_vm1, %v142_v16  ;;  %2433 = vmatpush3.xpose.msk.msra.mxu1 %vm143_vm1, %v347_v15  ;;  %v44_v16 = vld [vmem:[%s3182_s4 + $0x8] sm:$0xff] }
 0x143   :  { %v345_v17 = vpop.permute.xlu1 %344  ;;  %v140_v18 = vpop.permute.xlu0 %139 }
 0x144   :  { %2420 = vmatprep.subr.msk.mxu0 %vm143_vm1, %v140_v18  ;;  %2434 = vmatprep.subr.msk.mxu1 %vm143_vm1, %v345_v17 }
 0x145   :  { %2421 = vmatpush3.xpose.msk.msra.mxu0 %vm143_vm1, %v140_v18  ;;  %2435 = vmatpush3.xpose.msk.msra.mxu1 %vm143_vm1, %v345_v17  ;;  %v43_v17 = vld [vmem:[%s3182_s4] sm:$0xff]  ;;  %v46_v18 = vld [vmem:[%s3182_s4 + $0x18] sm:$0xff] }
 0x146   :  { %2453 = vmatprep.subr.mxu1 %v44_v16 }
 0x147   :  { %v343_v19 = vpop.permute.xlu1 %342  ;;  %v341_v20 = vpop.permute.xlu0 %340 }
 0x148   :  { %2423 = vmatmul.mubr.msk.f32.vlgmr.msra.gmra.mxu0 %vm143_vm1, %v134_v12  ;;  %2436 = vmatprep.mubr.msk.f32.mxu1 %vm143_vm1, %v341_v20 }
 0x149   :  { %2437 = vmatmul.mubr.msk.f32.vlgmr.msra.gmra.mxu1 %vm143_vm1, %v343_v19  ;;  %v45_v19 = vld [vmem:[%s3182_s4 + $0x10] sm:$0xff] }
 0x14a   :  { %2454 = vmatpush3.msra.mxu1 %v44_v16 }
 0x14b   :  { %2455 = vmatprep.subr.mxu1 %v43_v17 }
 0x14c   :  { %2456 = vmatpush3.msra.mxu1 %v43_v17  ;;  %v873_v17 = vld [vmem:[%s3184_s6 + $0x38] sm:$0xff] }
 0x14d   :  { %2471 = vmatprep.subr.mxu1 %v873_v17 }
 0x208   :  { %v2424_v21 = vpop.f32.mrf.mxu0 }
 0x209   :  { %v228_v23 = vmul.f32 0.25, %v2424_v21  ;;  %v2438_v24 = vpop.f32.mrf.mxu1 }
 0x20a   :  { %v218_v25 = vpop.f32.mrf.mxu0  ;;  %v432_v33 = vmul.f32 0.25, %v2438_v24 }
 0x20b   :  { %v227_v27 = vmul.f32 0.25, %v218_v25  ;;  %v422_v28 = vpop.f32.mrf.mxu1  ;;  %v230_v29 = vadd.f32 %v228_v23, %v2806_v22  ;;  %v708_v25 = vsub.s32 1, %v2768_v7 }
 0x20c   :  { %v431_v30 = vmul.f32 0.25, %v422_v28  ;;  %v434_v37 = vadd.f32 %v432_v33, %v2806_v22 }
 0x20d   :  { %v234_v31 = vsel %vm143_vm1, %v230_v29, -inf  ;;  %v229_v32 = vadd.f32 %v227_v27, %v2811_v26  ;;  %v709_v28 = vrot.slane %v2774_v9, %v708_v25 }
 0x20e   :  { %235 = vmax.xlane.f32.xlu1 %v234_v31  ;;  %v433_v35 = vadd.f32 %v431_v30, %v2811_v26  ;;  %v438_v38 = vsel %vm143_vm1, %v434_v37, -inf }
 0x20f   :  { %v231_v34 = vsel %vm143_vm1, %v229_v32, -inf }
 0x210   :  { %232 = vmax.xlane.f32.xlu0 %v231_v34  ;;  %v435_v36 = vsel %vm143_vm1, %v433_v35, -inf }
 0x214   :  { %436 = vmax.xlane.f32.xlu0 %v435_v36 }
 0x218   :  { %439 = vmax.xlane.f32.xlu0 %v438_v38 }
 0x21f   :  { %255 = vrot.lane.b32.xlu1 %v134_v12, %s2677_s1 }
 0x223   :  { %459 = vrot.lane.b32.xlu1 %v134_v12, %s2678_s18 }
 0x297   :  { %v236_v39 = vpop.xlane.xlu1 %235 }
 0x298   :  { %v238_v40 = vsub.f32 %v230_v29, %v236_v39 }
 0x299   :  { %v233_v41 = vpop.xlane.xlu0 %232 }
 0x29a   :  { %v241_v42 = vmul.f32 1.442695, %v238_v40  ;;  %v237_v43 = vsub.f32 %v229_v32, %v233_v41 }
 0x29b   :  { %v256_v44 = vpop.permute.xlu1 %255 }
 0x29c   :  { %2618 = vpow2.f32 %v241_v42  ;;  %v239_v45 = vmul.f32 1.442695, %v237_v43  ;;  %2425 = vmatprep.subr.mxu0 %v256_v44 }
 0x29d   :  { %2426 = vmatpush3.msra.mxu0 %v256_v44  ;;  %v437_v46 = vpop.xlane.xlu0 %436  ;;  %v760_v44 = vld [vmem:[%s3183_s5 + $0x8] sm:$0xff] }
 0x29e   :  { %2620 = vpow2.f32 %v239_v45  ;;  %v441_v47 = vsub.f32 %v433_v35, %v437_v46  ;;  %v759_v45 = vld [vmem:[%s3183_s5] sm:$0xff] }
 0x29f   :  { %v460_v60 = vpop.permute.xlu1 %459 }
 0x2a0   :  { %v443_v48 = vmul.f32 1.442695, %v441_v47 }
 0x2a1   :  { %v440_v49 = vpop.xlane.xlu0 %439 }
 0x2a2   :  { %2622 = vpow2.f32 %v443_v48  ;;  %v442_v50 = vsub.f32 %v434_v37, %v440_v49 }
 0x2a4   :  { %v445_v51 = vmul.f32 1.442695, %v442_v50 }
 0x2a6   :  { %2624 = vpow2.f32 %v445_v51 }
 0x2a9   :  { %v2619_v52 = vpop.eup %2618 }
 0x2aa   :  { %v246_v53 = vsel %vm143_vm1, %v2619_v52, 0.0 }
 0x2ab   :  { %v2621_v54 = vpop.eup %2620  ;;  %247 = vadd.xlane.f32.xlu0 %v246_v53 }
 0x2ac   :  { %v243_v55 = vsel %vm143_vm1, %v2621_v54, 0.0 }
 0x2ad   :  { %244 = vadd.xlane.f32.xlu1 %v243_v55 }
 0x2af   :  { %v2623_v56 = vpop.eup %2622 }
 0x2b0   :  { %v447_v57 = vsel %vm143_vm1, %v2623_v56, 0.0 }
 0x2b1   :  { %448 = vadd.xlane.f32.xlu1 %v447_v57 }
 0x2b3   :  { %v2625_v58 = vpop.eup %2624 }
 0x2b4   :  { %v450_v59 = vsel %vm143_vm1, %v2625_v58, 0.0 }
 0x2b5   :  { %451 = vadd.xlane.f32.xlu0 %v450_v59 }
 0x2c2   :  { %457 = vrot.lane.b32.xlu1 %v2779_v14, %s2678_s18 }
 0x2cb   :  { %253 = vrot.lane.b32.xlu0 %v2779_v14, %s2677_s1 }
 0x334   :  { %v248_v61 = vpop.xlane.xlu0 %247 }
 0x335   :  { %2626 = vrcp.f32 %v248_v61 }
 0x336   :  { %v245_v62 = vpop.xlane.xlu1 %244 }
 0x337   :  { %2628 = vrcp.f32 %v245_v62  ;;  %v749_v62 = vsub.s32 2, %v2768_v7 }
 0x33a   :  { %v449_v63 = vpop.xlane.xlu1 %448 }
 0x33b   :  { %2630 = vrcp.f32 %v449_v63  ;;  %v755_v63 = vsub.s32 3, %v2768_v7 }
 0x33e   :  { %v452_v0 = vpop.xlane.xlu0 %451  ;;  %v458_v12 = vpop.permute.xlu1 %457 }
 0x33f   :  { %2632 = vrcp.f32 %v452_v0 }
 0x342   :  { %v254_v1 = vpop.permute.xlu0 %253  ;;  %v2627_v3 = vpop.eup %2626 }
 0x343   :  { %2427 = vmatprep.subr.mxu0 %v254_v1  ;;  %v252_v10 = vmul.f32 %v2627_v3, %v2619_v52 }
 0x344   :  { %v2629_v4 = vpop.eup %2628  ;;  %2428 = vmatpush3.msra.mxu0 %v254_v1  ;;  %v750_v1 = vrot.slane %v2774_v9, %v749_v62 }
 0x345   :  { %2439 = vmatprep.subr.mxu0 %v460_v60  ;;  %v251_v6 = vmul.f32 %v2629_v4, %v2621_v54 }
 0x347   :  { %2429 = vmatprep.mubr.msk.f32.mxu0 %vm143_vm1, %v251_v6  ;;  %v756_v6 = vrot.slane %v2774_v9, %v755_v63 }
 0x348   :  { %v2631_v11 = vpop.eup %2630  ;;  %2430 = vmatmul.mubr.msk.f32.vlgmr.msra.gmra.mxu0 %vm143_vm1, %v252_v10 }
 0x349   :  { %2440 = vmatpush3.msra.mxu0 %v460_v60  ;;  %v455_v13 = vmul.f32 %v2631_v11, %v2623_v56 }
 0x34a   :  { %2441 = vmatprep.subr.mxu0 %v458_v12 }
 0x34b   :  { %2442 = vmatpush3.msra.mxu0 %v458_v12  ;;  %2443 = vmatprep.mubr.msk.f32.mxu0 %vm143_vm1, %v455_v13 }
 0x34c   :  { %v2633_v14 = vpop.eup %2632  ;;  %2446 = vmatprep.subr.mxu0 %v46_v18 }
 0x34d   :  { %v456_v15 = vmul.f32 %v2633_v14, %v2625_v58 }
 0x34f   :  { %2444 = vmatmul.mubr.msk.f32.vlgmr.msra.gmra.mxu0 %vm143_vm1, %v456_v15 }
 0x350   :  { %2447 = vmatpush3.msra.mxu0 %v46_v18  ;;  %v872_v18 = vld [vmem:[%s3184_s6 + $0x30] sm:$0xff] }
 0x351   :  { %2448 = vmatprep.subr.mxu0 %v45_v19 }
 0x352   :  { %2449 = vmatpush3.msra.mxu0 %v45_v19  ;;  %v871_v19 = vld [vmem:[%s3184_s6 + $0x28] sm:$0xff] }
 0x408   :  { %v2431_v20 = vpop.f32.mrf.mxu0 }
 0x40a   :  { %v331_v21 = vpop.f32.mrf.mxu0 }
 0x40b   :  { %2457 = vmatprep.mubr.msk.f32.mxu1 %vm143_vm1, %v331_v21  ;;  %v869_v21 = vld [vmem:[%s3184_s6 + $0x18] sm:$0xff] }
 0x40c   :  { %2458 = vmatmul.mubr.msk.f32.vlgmr.msra.gmra.mxu1 %vm143_vm1, %v2431_v20  ;;  %v870_v20 = vld [vmem:[%s3184_s6 + $0x20] sm:$0xff] }
 0x40d   :  { %2472 = vmatpush3.msra.mxu1 %v873_v17 }
 0x40e   :  { %2473 = vmatprep.subr.mxu1 %v872_v18 }
 0x40f   :  { %v2445_v23 = vpop.f32.mrf.mxu0  ;;  %2474 = vmatpush3.msra.mxu1 %v872_v18 }
 0x410   :  { %2475 = vmatprep.subr.mxu1 %v871_v19 }
 0x411   :  { %v535_v24 = vpop.f32.mrf.mxu0  ;;  %2476 = vmatpush3.msra.mxu1 %v871_v19 }
 0x412   :  { %2450 = vmatprep.mubr.msk.f32.mxu0 %vm143_vm1, %v535_v24  ;;  %2477 = vmatprep.subr.mxu1 %v870_v20  ;;  %v867_v24 = vld [vmem:[%s3184_s6 + $0x8] sm:$0xff] }
 0x413   :  { %2451 = vmatmul.mubr.msk.f32.vlgmr.msra.gmra.mxu0 %vm143_vm1, %v2445_v23  ;;  %2478 = vmatpush3.msra.mxu1 %v870_v20  ;;  %v868_v23 = vld [vmem:[%s3184_s6 + $0x10] sm:$0xff] }
 0x414   :  { %2479 = vmatprep.subr.mxu1 %v869_v21 }
 0x415   :  { %2480 = vmatpush3.msra.mxu1 %v869_v21 }
 0x416   :  { %2481 = vmatprep.subr.mxu1 %v868_v23 }
 0x417   :  { %2482 = vmatpush3.msra.mxu1 %v868_v23 }
 0x418   :  { %2483 = vmatprep.subr.mxu1 %v867_v24 }
 0x419   :  { %2484 = vmatpush3.msra.mxu1 %v867_v24 }
 0x4cc   :  { %v2459_v27 = vpop.f32.mrf.mxu1 }
 0x4ce   :  { %v697_v31 = vpop.f32.mrf.mxu1 }
 0x4d3   :  { %v2452_v29 = vpop.f32.mrf.mxu0 }
 0x4d4   :  { %v703_v30 = vadd.f32 %v2459_v27, %v2452_v29  ;;  %v866_v27 = vld [vmem:[%s3184_s6] sm:$0xff] }
 0x4d5   :  { %v616_v32 = vpop.f32.mrf.mxu0  ;;  %2485 = vmatprep.subr.mxu1 %v866_v27 }
 0x4d6   :  { %v711_v33 = vadd.f32 %v709_v28, %v703_v30  ;;  %v698_v34 = vadd.f32 %v697_v31, %v616_v32  ;;  %2486 = vmatpush3.msra.mxu1 %v866_v27 }
 0x4d8   :  { %v713_v35 = vadd.f32 %v711_v33, %v2764_v5  ;;  %v710_v36 = vadd.f32 %v709_v28, %v698_v34  ;;  %v762_v5 = vld [vmem:[%s3183_s5 + $0x18] sm:$0xff]  ;;  %v765_v28 = vsub.s32 4, %v2768_v7 }
 0x4d9   :  { %2460 = vmatprep.subr.mxu0 %v762_v5 }
 0x4da   :  { %v712_v37 = vadd.f32 %v710_v36, %v2751_v2  ;;  %v717_v38 = vsel %vm55_vm0, %v713_v35, 0.0  ;;  %v724_v42 = vmul.f32 %v713_v35, %v713_v35  ;;  %v761_v2 = vld [vmem:[%s3183_s5 + $0x10] sm:$0xff]  ;;  %2461 = vmatpush3.msra.mxu0 %v762_v5  ;;  %v766_v29 = vrot.slane %v2774_v9, %v765_v28 }
 0x4db   :  { %718 = vadd.xlane.f32.xlu1 %v717_v38  ;;  %2462 = vmatprep.subr.mxu0 %v761_v2 }
 0x4dc   :  { %v714_v39 = vsel %vm55_vm0, %v712_v37, 0.0  ;;  %v723_v40 = vmul.f32 %v712_v37, %v712_v37  ;;  %v728_v43 = vsel %vm55_vm0, %v724_v42, 0.0  ;;  %2463 = vmatpush3.msra.mxu0 %v761_v2 }
 0x4dd   :  { %715 = vadd.xlane.f32.xlu0 %v714_v39  ;;  %2464 = vmatprep.subr.mxu0 %v760_v44 }
 0x4de   :  { %v725_v41 = vsel %vm55_vm0, %v723_v40, 0.0  ;;  %2465 = vmatpush3.msra.mxu0 %v760_v44 }
 0x4df   :  { %2466 = vmatprep.subr.mxu0 %v759_v45 }
 0x4e0   :  { %2467 = vmatpush3.msra.mxu0 %v759_v45 }
 0x4e1   :  { %726 = vadd.xlane.f32.xlu0 %v725_v41 }
 0x4e5   :  { %729 = vadd.xlane.f32.xlu0 %v728_v43 }
 0x564   :  { %v719_v48 = vpop.xlane.xlu1 %718 }
 0x565   :  { %v722_v50 = vmul.f32 0.03125, %v719_v48 }
 0x566   :  { %v716_v46 = vpop.xlane.xlu0 %715 }
 0x567   :  { %v721_v47 = vmul.f32 0.03125, %v716_v46  ;;  %v734_v55 = vmul.f32 %v722_v50, %v722_v50  ;;  %v740_v10 = vsub.f32 %v713_v35, %v722_v50  ;;  %v876_v50 = vsub.s32 5, %v2768_v7 }
 0x569   :  { %v733_v51 = vmul.f32 %v721_v47, %v721_v47  ;;  %v739_v0 = vsub.f32 %v712_v37, %v721_v47 }
 0x56a   :  { %v727_v49 = vpop.xlane.xlu0 %726 }
 0x56b   :  { %v731_v52 = vmul.f32 0.03125, %v727_v49 }
 0x56d   :  { %v735_v53 = vsub.f32 %v731_v52, %v733_v51  ;;  %v877_v51 = vrot.slane %v2774_v9, %v876_v50 }
 0x56e   :  { %v730_v54 = vpop.xlane.xlu0 %729 }
 0x56f   :  { %v737_v56 = vmax.f32 %v735_v53, 0.0  ;;  %v732_v57 = vmul.f32 0.03125, %v730_v54 }
 0x571   :  { %v741_v58 = vadd.f32 1e-12, %v737_v56  ;;  %v736_v59 = vsub.f32 %v732_v57, %v734_v55 }
 0x573   :  { %2634 = vrsqrt.f32 %v741_v58  ;;  %v738_v60 = vmax.f32 %v736_v59, 0.0 }
 0x575   :  { %v742_v61 = vadd.f32 1e-12, %v738_v60 }
 0x577   :  { %2636 = vrsqrt.f32 %v742_v61 }
 0x580   :  { %v2635_v3 = vpop.eup %2634 }
 0x581   :  { %v745_v4 = vmul.f32 %v2635_v3, %v739_v0  ;;  %v2259_v3 = vld [vmem:[%s3178_s3 + $0x38] sm:$0xff] }
 0x582   :  { %2490 = vmatprep.subr.mxu0 %v2259_v3 }
 0x583   :  { %v751_v11 = vmul.f32 %v750_v1, %v745_v4  ;;  %v2258_v4 = vld [vmem:[%s3178_s3 + $0x30] sm:$0xff] }
 0x584   :  { %v2637_v12 = vpop.eup %2636 }
 0x585   :  { %v746_v13 = vmul.f32 %v2637_v12, %v740_v10  ;;  %v2881_v14 = vadd.f32 %v756_v6, %v751_v11  ;;  %v2256_v10 = vld [vmem:[%s3178_s3 + $0x20] sm:$0xff] }
 0x587   :  { %v752_v15 = vmul.f32 %v750_v1, %v746_v13  ;;  %2468 = vmatprep.mubr.msk.f32.mxu0 %vm55_vm0, %v2881_v14 }
 0x589   :  { %v758_v16 = vadd.f32 %v756_v6, %v752_v15  ;;  %v2257_v6 = vld [vmem:[%s3178_s3 + $0x28] sm:$0xff] }
 0x58b   :  { %2469 = vmatmul.mubr.msk.f32.vlgmr.msra.gmra.mxu0 %vm55_vm0, %v758_v16 }
 0x58c   :  { %2491 = vmatpush3.msra.mxu0 %v2259_v3 }
 0x58d   :  { %2492 = vmatprep.subr.mxu0 %v2258_v4 }
 0x58e   :  { %2493 = vmatpush3.msra.mxu0 %v2258_v4 }
 0x58f   :  { %2494 = vmatprep.subr.mxu0 %v2257_v6 }
 0x590   :  { %2495 = vmatpush3.msra.mxu0 %v2257_v6 }
 0x591   :  { %2496 = vmatprep.subr.mxu0 %v2256_v10 }
 0x592   :  { %2497 = vmatpush3.msra.mxu0 %v2256_v10 }
 0x64b   :  { %v2470_v30 = vpop.f32.mrf.mxu0 }
 0x64c   :  { %v845_v31 = vadd.f32 %v2470_v30, %v766_v29 }
 0x64d   :  { %v839_v32 = vpop.f32.mrf.mxu0 }
 0x64e   :  { %v849_v33 = vmul.f32 %v845_v31, %v845_v31  ;;  %v853_v34 = vmul.f32 0.044715, %v845_v31  ;;  %v840_v35 = vadd.f32 %v839_v32, %v766_v29  ;;  %v851_v47 = vmul.f32 0.5, %v845_v31 }
 0x650   :  { %v855_v36 = vmul.f32 %v853_v34, %v849_v33  ;;  %v848_v37 = vmul.f32 %v840_v35, %v840_v35  ;;  %v852_v38 = vmul.f32 0.044715, %v840_v35  ;;  %v850_v45 = vmul.f32 0.5, %v840_v35 }
 0x652   :  { %v857_v39 = vadd.f32 %v855_v36, %v845_v31  ;;  %v854_v40 = vmul.f32 %v852_v38, %v848_v37  ;;  %v996_v31 = vsub.s32 6, %v2768_v7 }
 0x654   :  { %v859_v41 = vmul.f32 0.7978846, %v857_v39  ;;  %v856_v42 = vadd.f32 %v854_v40, %v840_v35  ;;  %v997_v34 = vrot.slane %v2774_v9, %v996_v31  ;;  %v1002_v35 = vsub.s32 7, %v2768_v7  ;;  %v2048_v7 = vld [vmem:[%s3187_s8 + $0x10] sm:$0xff] }
 0x656   :  { %2638 = vtanh.f32 %v859_v41  ;;  %v858_v43 = vmul.f32 0.7978846, %v856_v42  ;;  %v1003_v41 = vrot.slane %v2774_v9, %v1002_v35 }
 0x658   :  { %2640 = vtanh.f32 %v858_v43 }
 0x663   :  { %v2639_v5 = vpop.eup %2638 }
 0x664   :  { %v863_v44 = vadd.f32 1.0, %v2639_v5 }
 0x665   :  { %v2641_v2 = vpop.eup %2640 }
 0x666   :  { %v862_v46 = vadd.f32 1.0, %v2641_v2  ;;  %v865_v49 = vmul.f32 %v863_v44, %v851_v47  ;;  %v2956_v2 = vld [vmem:[%s3180_s7 + $0x8] sm:$0xff] }
 0x667   :  { %v1021_v9 = vrot.slane %v2956_v2, %v53_v8 }
 0x668   :  { %v864_v48 = vmul.f32 %v862_v46, %v850_v45 }
 0x66a   :  { %2487 = vmatprep.mubr.msk.f32.mxu1 %vm878_vm2, %v864_v48 }
 0x66b   :  { %2488 = vmatmul.mubr.msk.f32.vlgmr.msra.gmra.mxu1 %vm878_vm2, %v865_v49 }
 0x72b   :  { %v2489_v52 = vpop.f32.mrf.mxu1 }
 0x72c   :  { %v957_v53 = vadd.f32 %v2489_v52, %v877_v51 }
 0x72d   :  { %v951_v54 = vpop.f32.mrf.mxu1 }
 0x72e   :  { %v961_v55 = vadd.f32 %v957_v53, %v758_v16  ;;  %v952_v56 = vadd.f32 %v951_v54, %v877_v51 }
 0x730   :  { %v960_v57 = vadd.f32 %v952_v56, %v2881_v14  ;;  %v965_v58 = vsel %vm55_vm0, %v961_v55, 0.0  ;;  %v971_v59 = vmul.f32 %v961_v55, %v961_v55 }
 0x731   :  { %966 = vadd.xlane.f32.xlu0 %v965_v58 }
 0x732   :  { %v962_v60 = vsel %vm55_vm0, %v960_v57, 0.0  ;;  %v970_v61 = vmul.f32 %v960_v57, %v960_v57  ;;  %v975_v0 = vsel %vm55_vm0, %v971_v59, 0.0 }
 0x733   :  { %963 = vadd.xlane.f32.xlu1 %v962_v60 }
 0x734   :  { %v972_v1 = vsel %vm55_vm0, %v970_v61, 0.0 }
 0x735   :  { %976 = vadd.xlane.f32.xlu0 %v975_v0 }
 0x737   :  { %973 = vadd.xlane.f32.xlu1 %v972_v1 }
 0x7ba   :  { %v967_v11 = vpop.xlane.xlu0 %966 }
 0x7bb   :  { %v969_v12 = vmul.f32 0.03125, %v967_v11 }
 0x7bc   :  { %v964_v13 = vpop.xlane.xlu1 %963 }
 0x7bd   :  { %v968_v14 = vmul.f32 0.03125, %v964_v13  ;;  %v981_v16 = vmul.f32 %v969_v12, %v969_v12  ;;  %v987_v32 = vsub.f32 %v961_v55, %v969_v12 }
 0x7be   :  { %v977_v15 = vpop.xlane.xlu0 %976 }
 0x7bf   :  { %v979_v17 = vmul.f32 0.03125, %v977_v15  ;;  %v980_v19 = vmul.f32 %v968_v14, %v968_v14  ;;  %v986_v36 = vsub.f32 %v960_v57, %v968_v14 }
 0x7c0   :  { %v974_v18 = vpop.xlane.xlu1 %973 }
 0x7c1   :  { %v983_v20 = vsub.f32 %v979_v17, %v981_v16  ;;  %v978_v21 = vmul.f32 0.03125, %v974_v18 }
 0x7c3   :  { %v985_v23 = vmax.f32 %v983_v20, 0.0  ;;  %v982_v24 = vsub.f32 %v978_v21, %v980_v19 }
 0x7c5   :  { %v989_v27 = vadd.f32 1e-12, %v985_v23  ;;  %v984_v29 = vmax.f32 %v982_v24, 0.0  ;;  %v2253_v24 = vld [vmem:[%s3182_s4 + $0x28] sm:$0xff] }
 0x7c7   :  { %2642 = vrsqrt.f32 %v989_v27  ;;  %v988_v30 = vadd.f32 1e-12, %v984_v29  ;;  %v2252_v27 = vld [vmem:[%s3182_s4 + $0x20] sm:$0xff] }
 0x7c9   :  { %2644 = vrsqrt.f32 %v988_v30 }
 0x7d4   :  { %v2643_v33 = vpop.eup %2642 }
 0x7d5   :  { %v993_v37 = vmul.f32 %v2643_v33, %v987_v32 }
 0x7d6   :  { %v2645_v38 = vpop.eup %2644 }
 0x7d7   :  { %v992_v39 = vmul.f32 %v2645_v38, %v986_v36  ;;  %v999_v40 = vmul.f32 %v997_v34, %v993_v37 }
 0x7d9   :  { %v998_v42 = vmul.f32 %v997_v34, %v992_v39  ;;  %v2947_v5 = vadd.f32 %v1003_v41, %v999_v40 }
 0x7db   :  { %v2945_v43 = vadd.f32 %v1003_v41, %v998_v42 }
 0x7dd   :  { %2498 = vmatprep.mubr.msk.f32.mxu0 %vm55_vm0, %v2945_v43 }
 0x7de   :  { %2499 = vmatmul.mubr.msk.f32.vlgmr.msra.gmra.mxu0 %vm55_vm0, %v2947_v5 }
 0x89e   :  { %v2500_v44 = vpop.f32.mrf.mxu0 }
 0x89f   :  { %v2961_v45 = vadd.f32 %v2500_v44, %v1021_v9 }
 0x8a0   :  { %v1094_v46 = vpop.f32.mrf.mxu0 }
 0x8a1   :  { %v2963_v47 = vadd.f32 %v1094_v46, %v1021_v9  ;;  %1107 = vrot.lane.b32.xlu1 %v2961_v45, %s2675_s12 }
 0x8a3   :  { %1105 = vrot.lane.b32.xlu0 %v2963_v47, %s2675_s12  ;;  %2505 = vmatprep.mubr.msk.f32.mxu0 %vm143_vm1, %v2963_v47 }
 0x913   :  { %v1108_v48 = vpop.permute.xlu1 %1107 }
 0x914   :  { %2501 = vmatprep.subr.msk.mxu0 %vm143_vm1, %v1108_v48 }
 0x915   :  { %2502 = vmatpush3.xpose.msk.msra.mxu0 %vm143_vm1, %v1108_v48  ;;  %v1106_v8 = vpop.permute.xlu0 %1105 }
 0x916   :  { %2503 = vmatprep.subr.msk.mxu0 %vm143_vm1, %v1106_v8 }
 0x919   :  { %2504 = vmatpush3.xpose.msk.msra.mxu0 %vm143_vm1, %v1106_v8 }
 0x91c   :  { %2506 = vmatmul.mubr.msk.f32.vlgmr.msra.gmra.mxu0 %vm143_vm1, %v2961_v45 }
 0x9dc   :  { %v2507_v49 = vpop.f32.mrf.mxu0 }
 0x9dd   :  { %v1193_v51 = vmul.f32 0.25, %v2507_v49 }
 0x9de   :  { %v1183_v52 = vpop.f32.mrf.mxu0 }
 0x9df   :  { %v1192_v53 = vmul.f32 0.25, %v1183_v52  ;;  %v1195_v54 = vadd.f32 %v1193_v51, %v2806_v22 }
 0x9e1   :  { %v1199_v55 = vsel %vm143_vm1, %v1195_v54, -inf  ;;  %v1194_v56 = vadd.f32 %v1192_v53, %v2811_v26 }
 0x9e2   :  { %1200 = vmax.xlane.f32.xlu0 %v1199_v55 }
 0x9e3   :  { %v1196_v57 = vsel %vm143_vm1, %v1194_v56, -inf }
 0x9e4   :  { %1197 = vmax.xlane.f32.xlu1 %v1196_v57 }
 0x9f5   :  { %1220 = vrot.lane.b32.xlu1 %v2961_v45, %s2677_s1 }
 0x9f9   :  { %1311 = vrot.lane.b32.xlu1 %v2961_v45, %s2674_s0 }
 0x9fd   :  { %1309 = vrot.lane.b32.xlu1 %v2963_v47, %s2674_s0 }
 0xa6b   :  { %v1201_v58 = vpop.xlane.xlu0 %1200 }
 0xa6c   :  { %v1203_v59 = vsub.f32 %v1195_v54, %v1201_v58  ;;  %v2255_v58 = vld [vmem:[%s3182_s4 + $0x38] sm:$0xff] }
 0xa6d   :  { %v1198_v60 = vpop.xlane.xlu1 %1197 }
 0xa6e   :  { %v1206_v61 = vmul.f32 1.442695, %v1203_v59  ;;  %v1202_v0 = vsub.f32 %v1194_v56, %v1198_v60 }
 0xa70   :  { %2646 = vpow2.f32 %v1206_v61  ;;  %v1204_v1 = vmul.f32 1.442695, %v1202_v0  ;;  %v1674_v0 = vrot.slane %v2956_v2, %v708_v25 }
 0xa71   :  { %v1221_v3 = vpop.permute.xlu1 %1220 }
 0xa72   :  { %2648 = vpow2.f32 %v1204_v1  ;;  %2508 = vmatprep.subr.mxu1 %v1221_v3 }
 0xa73   :  { %2509 = vmatpush3.msra.mxu1 %v1221_v3 }
 0xa75   :  { %v1312_v12 = vpop.permute.xlu1 %1311 }
 0xa79   :  { %v1310_v13 = vpop.permute.xlu1 %1309 }
 0xa7d   :  { %v2647_v4 = vpop.eup %2646 }
 0xa7e   :  { %v1211_v6 = vsel %vm143_vm1, %v2647_v4, 0.0 }
 0xa7f   :  { %v2649_v10 = vpop.eup %2648  ;;  %1212 = vadd.xlane.f32.xlu0 %v1211_v6 }
 0xa80   :  { %v1208_v11 = vsel %vm143_vm1, %v2649_v10, 0.0 }
 0xa81   :  { %1209 = vadd.xlane.f32.xlu1 %v1208_v11 }
 0xa92   :  { %1307 = vrot.lane.b32.xlu1 %v2961_v45, %s2676_s13 }
 0xa95   :  { %1218 = vrot.lane.b32.xlu0 %v2963_v47, %s2677_s1 }
 0xa99   :  { %1305 = vrot.lane.b32.xlu0 %v2963_v47, %s2676_s13 }
 0xb08   :  { %v1213_v14 = vpop.xlane.xlu0 %1212 }
 0xb09   :  { %2650 = vrcp.f32 %v1213_v14 }
 0xb0a   :  { %v1210_v15 = vpop.xlane.xlu1 %1209 }
 0xb0b   :  { %2652 = vrcp.f32 %v1210_v15 }
 0xb0c   :  { %v1219_v16 = vpop.permute.xlu0 %1218 }
 0xb0d   :  { %2510 = vmatprep.subr.mxu1 %v1219_v16 }
 0xb0e   :  { %2511 = vmatpush3.msra.mxu1 %v1219_v16  ;;  %v1308_v23 = vpop.permute.xlu1 %1307 }
 0xb0f   :  { %2515 = vmatprep.subr.msk.mxu1 %vm143_vm1, %v1312_v12 }
 0xb10   :  { %v1306_v21 = vpop.permute.xlu0 %1305 }
 0xb16   :  { %v2651_v17 = vpop.eup %2650 }
 0xb17   :  { %v1217_v20 = vmul.f32 %v2651_v17, %v2647_v4 }
 0xb18   :  { %v2653_v18 = vpop.eup %2652 }
 0xb19   :  { %v1216_v19 = vmul.f32 %v2653_v18, %v2649_v10 }
 0xb1b   :  { %2512 = vmatprep.mubr.msk.f32.mxu1 %vm143_vm1, %v1216_v19 }
 0xb1c   :  { %2513 = vmatmul.mubr.msk.f32.vlgmr.msra.gmra.mxu1 %vm143_vm1, %v1217_v20  ;;  %v2279_v20 = vld [vmem:[%s3183_s5 + $0x28] sm:$0xff] }
 0xb1d   :  { %2516 = vmatpush3.xpose.msk.msra.mxu1 %vm143_vm1, %v1312_v12  ;;  %2519 = vmatprep.mubr.msk.f32.mxu1 %vm143_vm1, %v1306_v21  ;;  %v2278_v21 = vld [vmem:[%s3183_s5 + $0x20] sm:$0xff] }
 0xb1e   :  { %2517 = vmatprep.subr.msk.mxu1 %vm143_vm1, %v1310_v13 }
 0xb21   :  { %2518 = vmatpush3.xpose.msk.msra.mxu1 %vm143_vm1, %v1310_v13 }
 0xb22   :  { %2536 = vmatprep.subr.mxu1 %v2253_v24 }
 0xb24   :  { %2520 = vmatmul.mubr.msk.f32.vlgmr.msra.gmra.mxu1 %vm143_vm1, %v1308_v23 }
 0xb25   :  { %2537 = vmatpush3.msra.mxu1 %v2253_v24 }
 0xb26   :  { %2538 = vmatprep.subr.mxu1 %v2252_v27 }
 0xb27   :  { %2539 = vmatpush3.msra.mxu1 %v2252_v27 }
 0xbdc   :  { %v2514_v29 = vpop.f32.mrf.mxu1 }
 0xbde   :  { %v1296_v30 = vpop.f32.mrf.mxu1 }
 0xbdf   :  { %2540 = vmatprep.mubr.msk.f32.mxu1 %vm143_vm1, %v1296_v30 }
 0xbe0   :  { %2541 = vmatmul.mubr.msk.f32.vlgmr.msra.gmra.mxu1 %vm143_vm1, %v2514_v29 }
 0xbe4   :  { %v2521_v32 = vpop.f32.mrf.mxu1 }
 0xbe5   :  { %v1397_v33 = vmul.f32 0.25, %v2521_v32 }
 0xbe6   :  { %v1387_v34 = vpop.f32.mrf.mxu1 }
 0xbe7   :  { %v1396_v36 = vmul.f32 0.25, %v1387_v34  ;;  %v1399_v37 = vadd.f32 %v1397_v33, %v2806_v22 }
 0xbe9   :  { %v1403_v38 = vsel %vm143_vm1, %v1399_v37, -inf  ;;  %v1398_v39 = vadd.f32 %v1396_v36, %v2811_v26 }
 0xbea   :  { %1404 = vmax.xlane.f32.xlu1 %v1403_v38 }
 0xbeb   :  { %v1400_v40 = vsel %vm143_vm1, %v1398_v39, -inf }
 0xbec   :  { %1401 = vmax.xlane.f32.xlu0 %v1400_v40 }
 0xbfb   :  { %1424 = vrot.lane.b32.xlu1 %v2961_v45, %s2678_s18 }
 0xc73   :  { %v1405_v41 = vpop.xlane.xlu1 %1404 }
 0xc74   :  { %v1407_v42 = vsub.f32 %v1399_v37, %v1405_v41 }
 0xc75   :  { %v1402_v9 = vpop.xlane.xlu0 %1401 }
 0xc76   :  { %v1410_v44 = vmul.f32 1.442695, %v1407_v42  ;;  %v1406_v46 = vsub.f32 %v1398_v39, %v1402_v9 }
 0xc77   :  { %v1425_v48 = vpop.permute.xlu1 %1424 }
 0xc78   :  { %2654 = vpow2.f32 %v1410_v44  ;;  %v1408_v8 = vmul.f32 1.442695, %v1406_v46  ;;  %2522 = vmatprep.subr.mxu0 %v1425_v48 }
 0xc79   :  { %2523 = vmatpush3.msra.mxu0 %v1425_v48  ;;  %v1714_v48 = vrot.slane %v2956_v2, %v749_v62  ;;  %v2291_v62 = vld [vmem:[%s3184_s6 + $0x78] sm:$0xff] }
 0xc7a   :  { %2656 = vpow2.f32 %v1408_v8  ;;  %2554 = vmatprep.subr.mxu1 %v2291_v62 }
 0xc7b   :  { %2555 = vmatpush3.msra.mxu1 %v2291_v62 }
 0xc85   :  { %v2655_v22 = vpop.eup %2654 }
 0xc86   :  { %v1415_v26 = vsel %vm143_vm1, %v2655_v22, 0.0 }
 0xc87   :  { %v2657_v49 = vpop.eup %2656  ;;  %1416 = vadd.xlane.f32.xlu0 %v1415_v26 }
 0xc88   :  { %v1412_v51 = vsel %vm143_vm1, %v2657_v49, 0.0 }
 0xc8b   :  { %1413 = vadd.xlane.f32.xlu0 %v1412_v51 }
 0xca0   :  { %v2542_v61 = vpop.f32.mrf.mxu1 }
 0xca1   :  { %1422 = vrot.lane.b32.xlu0 %v2963_v47, %s2678_s18  ;;  %v2254_v47 = vld [vmem:[%s3182_s4 + $0x30] sm:$0xff] }
 0xca2   :  { %v1662_v4 = vpop.f32.mrf.mxu1 }
 0xd10   :  { %v1417_v45 = vpop.xlane.xlu0 %1416 }
 0xd11   :  { %2658 = vrcp.f32 %v1417_v45  ;;  %v1720_v45 = vrot.slane %v2956_v2, %v755_v63  ;;  %v2289_v63 = vld [vmem:[%s3184_s6 + $0x68] sm:$0xff] }
 0xd14   :  { %v1414_v52 = vpop.xlane.xlu0 %1413 }
 0xd15   :  { %2660 = vrcp.f32 %v1414_v52 }
 0xd18   :  { %v1423_v53 = vpop.permute.xlu0 %1422 }
 0xd19   :  { %2524 = vmatprep.subr.mxu0 %v1423_v53 }
 0xd1a   :  { %2525 = vmatpush3.msra.mxu0 %v1423_v53 }
 0xd1b   :  { %2529 = vmatprep.subr.mxu0 %v2255_v58 }
 0xd1e   :  { %v2659_v54 = vpop.eup %2658 }
 0xd1f   :  { %v1421_v57 = vmul.f32 %v2659_v54, %v2655_v22 }
 0xd22   :  { %v2661_v55 = vpop.eup %2660 }
 0xd23   :  { %v1420_v56 = vmul.f32 %v2661_v55, %v2657_v49  ;;  %v2290_v55 = vld [vmem:[%s3184_s6 + $0x70] sm:$0xff] }
 0xd24   :  { %2556 = vmatprep.subr.mxu1 %v2290_v55 }
 0xd25   :  { %2526 = vmatprep.mubr.msk.f32.mxu0 %vm143_vm1, %v1420_v56  ;;  %2557 = vmatpush3.msra.mxu1 %v2290_v55  ;;  %v2288_v56 = vld [vmem:[%s3184_s6 + $0x60] sm:$0xff] }
 0xd26   :  { %2527 = vmatmul.mubr.msk.f32.vlgmr.msra.gmra.mxu0 %vm143_vm1, %v1421_v57  ;;  %2558 = vmatprep.subr.mxu1 %v2289_v63  ;;  %v2287_v57 = vld [vmem:[%s3184_s6 + $0x58] sm:$0xff] }
 0xd27   :  { %2530 = vmatpush3.msra.mxu0 %v2255_v58  ;;  %2559 = vmatpush3.msra.mxu1 %v2289_v63  ;;  %v2286_v58 = vld [vmem:[%s3184_s6 + $0x50] sm:$0xff]  ;;  %v1962_v63 = vrot.slane %v2956_v2, %v996_v31  ;;  %v2049_v31 = vld [vmem:[%s3187_s8 + $0x18] sm:$0xff] }
 0xd28   :  { %2531 = vmatprep.subr.mxu0 %v2254_v47  ;;  %2560 = vmatprep.subr.mxu1 %v2288_v56 }
 0xd29   :  { %2532 = vmatpush3.msra.mxu0 %v2254_v47  ;;  %2561 = vmatpush3.msra.mxu1 %v2288_v56  ;;  %v2285_v47 = vld [vmem:[%s3184_s6 + $0x48] sm:$0xff] }
 0xd2a   :  { %2562 = vmatprep.subr.mxu1 %v2287_v57 }
 0xd2b   :  { %2563 = vmatpush3.msra.mxu1 %v2287_v57 }
 0xd2c   :  { %2564 = vmatprep.subr.mxu1 %v2286_v58 }
 0xd2d   :  { %2565 = vmatpush3.msra.mxu1 %v2286_v58 }
 0xd2e   :  { %2566 = vmatprep.subr.mxu1 %v2285_v47 }
 0xd2f   :  { %2567 = vmatpush3.msra.mxu1 %v2285_v47  ;;  %v1968_v47 = vrot.slane %v2956_v2, %v1002_v35  ;;  %v2047_v35 = vld [vmem:[%s3187_s8 + $0x8] sm:$0xff] }
 0xde6   :  { %v2528_v59 = vpop.f32.mrf.mxu0 }
 0xde8   :  { %v1500_v60 = vpop.f32.mrf.mxu0 }
 0xde9   :  { %2533 = vmatprep.mubr.msk.f32.mxu0 %vm143_vm1, %v1500_v60  ;;  %v1731_v60 = vrot.slane %v2956_v2, %v765_v28 }
 0xdea   :  { %2534 = vmatmul.mubr.msk.f32.vlgmr.msra.gmra.mxu0 %vm143_vm1, %v2528_v59  ;;  %v2284_v59 = vld [vmem:[%s3184_s6 + $0x40] sm:$0xff] }
 0xdeb   :  { %2568 = vmatprep.subr.mxu1 %v2284_v59 }
 0xdec   :  { %2569 = vmatpush3.msra.mxu1 %v2284_v59 }
 0xeaa   :  { %v2535_v1 = vpop.f32.mrf.mxu0 }
 0xeab   :  { %v1668_v3 = vadd.f32 %v2542_v61, %v2535_v1 }
 0xeac   :  { %v1581_v6 = vpop.f32.mrf.mxu0 }
 0xead   :  { %v1676_v10 = vadd.f32 %v1674_v0, %v1668_v3  ;;  %v1663_v11 = vadd.f32 %v1662_v4, %v1581_v6 }
 0xeaf   :  { %v1678_v12 = vadd.f32 %v1676_v10, %v2947_v5  ;;  %v1675_v13 = vadd.f32 %v1674_v0, %v1663_v11  ;;  %v2281_v5 = vld [vmem:[%s3183_s5 + $0x38] sm:$0xff] }
 0xeb0   :  { %2543 = vmatprep.subr.mxu0 %v2281_v5 }
 0xeb1   :  { %v1677_v14 = vadd.f32 %v1675_v13, %v2945_v43  ;;  %v1682_v15 = vsel %vm55_vm0, %v1678_v12, 0.0  ;;  %v1688_v16 = vmul.f32 %v1678_v12, %v1678_v12  ;;  %v2280_v43 = vld [vmem:[%s3183_s5 + $0x30] sm:$0xff]  ;;  %2544 = vmatpush3.msra.mxu0 %v2281_v5 }
 0xeb2   :  { %1683 = vadd.xlane.f32.xlu0 %v1682_v15  ;;  %2545 = vmatprep.subr.mxu0 %v2280_v43 }
 0xeb3   :  { %v1679_v17 = vsel %vm55_vm0, %v1677_v14, 0.0  ;;  %v1687_v18 = vmul.f32 %v1677_v14, %v1677_v14  ;;  %v1692_v25 = vsel %vm55_vm0, %v1688_v16, 0.0  ;;  %2546 = vmatpush3.msra.mxu0 %v2280_v43 }
 0xeb4   :  { %1680 = vadd.xlane.f32.xlu1 %v1679_v17  ;;  %2547 = vmatprep.subr.mxu0 %v2279_v20 }
 0xeb5   :  { %v1689_v19 = vsel %vm55_vm0, %v1687_v18, 0.0  ;;  %2548 = vmatpush3.msra.mxu0 %v2279_v20 }
 0xeb6   :  { %1693 = vadd.xlane.f32.xlu0 %v1692_v25  ;;  %2549 = vmatprep.subr.mxu0 %v2278_v21 }
 0xeb7   :  { %2550 = vmatpush3.msra.mxu0 %v2278_v21 }
 0xeb8   :  { %1690 = vadd.xlane.f32.xlu1 %v1689_v19 }
 0xf3b   :  { %v1684_v23 = vpop.xlane.xlu0 %1683 }
 0xf3c   :  { %v1686_v24 = vmul.f32 0.03125, %v1684_v23  ;;  %v1843_v23 = vrot.slane %v2956_v2, %v876_v50  ;;  %v2679_v50 = vmov 0.0   ;;  %v2046_v2 = vld [vmem:[%s3187_s8] sm:$0xff] }
 0xf3d   :  { %v1681_v27 = vpop.xlane.xlu1 %1680  ;;  %2573 = vmatprep.subr.mxu0 %v2679_v50  ;;  %2591 = vmatprep.subr.mxu1 %v2679_v50  ;;  %2216 = vst [vmem:[%s3185_s11] sm:$0xff] %v2679_v50 }
 0xf3e   :  { %v1685_v29 = vmul.f32 0.03125, %v1681_v27  ;;  %v1698_v32 = vmul.f32 %v1686_v24, %v1686_v24  ;;  %v1704_v44 = vsub.f32 %v1678_v12, %v1686_v24 }
 0xf3f   :  { %v1694_v30 = vpop.xlane.xlu0 %1693 }
 0xf40   :  { %v1696_v33 = vmul.f32 0.03125, %v1694_v30  ;;  %v1697_v36 = vmul.f32 %v1685_v29, %v1685_v29  ;;  %v1703_v8 = vsub.f32 %v1677_v14, %v1685_v29 }
 0xf41   :  { %v1691_v34 = vpop.xlane.xlu1 %1690 }
 0xf42   :  { %v1700_v37 = vsub.f32 %v1696_v33, %v1698_v32  ;;  %v1695_v38 = vmul.f32 0.03125, %v1691_v34 }
 0xf44   :  { %v1702_v39 = vmax.f32 %v1700_v37, 0.0  ;;  %v1699_v40 = vsub.f32 %v1695_v38, %v1697_v36 }
 0xf46   :  { %v1706_v41 = vadd.f32 1e-12, %v1702_v39  ;;  %v1701_v42 = vmax.f32 %v1699_v40, 0.0 }
 0xf48   :  { %2662 = vrsqrt.f32 %v1706_v41  ;;  %v1705_v9 = vadd.f32 1e-12, %v1701_v42 }
 0xf4a   :  { %2664 = vrsqrt.f32 %v1705_v9 }
 0xf55   :  { %v2663_v46 = vpop.eup %2662 }
 0xf56   :  { %v1710_v22 = vmul.f32 %v2663_v46, %v1704_v44 }
 0xf57   :  { %v2665_v26 = vpop.eup %2664 }
 0xf58   :  { %v1709_v49 = vmul.f32 %v2665_v26, %v1703_v8  ;;  %v1716_v51 = vmul.f32 %v1714_v48, %v1710_v22 }
 0xf5a   :  { %v1715_v52 = vmul.f32 %v1714_v48, %v1709_v49  ;;  %v1722_v54 = vadd.f32 %v1720_v45, %v1716_v51 }
 0xf5c   :  { %v1721_v53 = vadd.f32 %v1720_v45, %v1715_v52 }
 0xf5e   :  { %2551 = vmatprep.mubr.msk.f32.mxu0 %vm55_vm0, %v1721_v53 }
 0xf5f   :  { %2552 = vmatmul.mubr.msk.f32.vlgmr.msra.gmra.mxu0 %vm55_vm0, %v1722_v54 }
 0xf60   :  { %2577 = vmatprep.mubr.msk.f32.mxu0 %vm2680_vm3, %v2679_v50 }
0x101f   :  { %v2553_v61 = vpop.f32.mrf.mxu0 }
0x1020   :  { %v1810_v0 = vadd.f32 %v2553_v61, %v1731_v60 }
0x1021   :  { %v1804_v1 = vpop.f32.mrf.mxu0 }
0x1022   :  { %v1814_v3 = vmul.f32 %v1810_v0, %v1810_v0  ;;  %v1818_v4 = vmul.f32 0.044715, %v1810_v0  ;;  %v1805_v6 = vadd.f32 %v1804_v1, %v1731_v60  ;;  %v1816_v43 = vmul.f32 0.5, %v1810_v0 }
0x1024   :  { %v1820_v10 = vmul.f32 %v1818_v4, %v1814_v3  ;;  %v1813_v11 = vmul.f32 %v1805_v6, %v1805_v6  ;;  %v1817_v12 = vmul.f32 0.044715, %v1805_v6  ;;  %v1815_v28 = vmul.f32 0.5, %v1805_v6  ;;  %v1971_v4 = vld [vmem:[%s3186_s2] sm:$0x3] }
0x1026   :  { %v1822_v13 = vadd.f32 %v1820_v10, %v1810_v0  ;;  %v1819_v14 = vmul.f32 %v1817_v12, %v1813_v11  ;;  %v2138_v10 = vld [vmem:[%s3188_s9 + $0x30] sm:$0xff]  ;;  %v2295_v11 = vld [vmem:[%s3189_s10] ss:$0 sm:$0xff]  ;;  %v2137_v12 = vld [vmem:[%s3188_s9 + $0x28] sm:$0xff] }
0x1028   :  { %v1824_v15 = vmul.f32 0.7978846, %v1822_v13  ;;  %v1821_v16 = vadd.f32 %v1819_v14, %v1805_v6  ;;  %v2139_v6 = vld [vmem:[%s3188_s9 + $0x38] sm:$0xff]  ;;  %v2136_v13 = vld [vmem:[%s3188_s9 + $0x20] sm:$0xff] }
0x1029   :  { %v2135_v14 = vld [vmem:[%s3188_s9 + $0x18] sm:$0xff] }
0x102a   :  { %2666 = vtanh.f32 %v1824_v15  ;;  %v1823_v17 = vmul.f32 0.7978846, %v1821_v16 }
0x102c   :  { %2668 = vtanh.f32 %v1823_v17  ;;  %v2134_v17 = vld [vmem:[%s3188_s9 + $0x10] sm:$0xff] }
0x1037   :  { %v2667_v18 = vpop.eup %2666 }
0x1038   :  { %v1828_v19 = vadd.f32 1.0, %v2667_v18  ;;  %v2133_v18 = vld [vmem:[%s3188_s9 + $0x8] sm:$0xff] }
0x1039   :  { %v2669_v25 = vpop.eup %2668 }
0x103a   :  { %v1827_v5 = vadd.f32 1.0, %v2669_v25  ;;  %v1830_v21 = vmul.f32 %v1828_v19, %v1816_v43  ;;  %v2132_v25 = vld [vmem:[%s3188_s9] sm:$0xff] }
0x103c   :  { %v1829_v20 = vmul.f32 %v1827_v5, %v1815_v28 }
0x103e   :  { %2570 = vmatprep.mubr.msk.f32.mxu1 %vm878_vm2, %v1829_v20 }
0x103f   :  { %2571 = vmatmul.mubr.msk.f32.vlgmr.msra.gmra.mxu1 %vm878_vm2, %v1830_v21 }
0x1040   :  { %2607 = vmatprep.mubr.msk.f32.mxu1 %vm2680_vm3, %v2679_v50  ;;  %2592 = vmatpush3.msra.mxu1 %v2139_v6 }
0x1041   :  { %2593 = vmatprep.subr.mxu1 %v2679_v50 }
0x1042   :  { %2594 = vmatpush3.msra.mxu1 %v2138_v10 }
0x1043   :  { %2595 = vmatprep.subr.mxu1 %v2679_v50 }
0x1044   :  { %2596 = vmatpush3.msra.mxu1 %v2137_v12 }
0x1045   :  { %2597 = vmatprep.subr.mxu1 %v2679_v50 }
0x1046   :  { %2598 = vmatpush3.msra.mxu1 %v2136_v13 }
0x1047   :  { %2599 = vmatprep.subr.mxu1 %v2679_v50 }
0x1048   :  { %2600 = vmatpush3.msra.mxu1 %v2135_v14 }
0x1049   :  { %2601 = vmatprep.subr.mxu1 %v2679_v50 }
0x104a   :  { %2602 = vmatpush3.msra.mxu1 %v2134_v17 }
0x104b   :  { %2603 = vmatprep.subr.mxu1 %v2679_v50 }
0x104c   :  { %2604 = vmatpush3.msra.mxu1 %v2133_v18 }
0x104d   :  { %2605 = vmatprep.subr.mxu1 %v2679_v50 }
0x104e   :  { %2606 = vmatpush3.msra.mxu1 %v2132_v25 }
0x10ff   :  { %v2572_v24 = vpop.f32.mrf.mxu1 }
0x1100   :  { %v1922_v27 = vadd.f32 %v2572_v24, %v1843_v23 }
0x1101   :  { %v1916_v29 = vpop.f32.mrf.mxu1 }
0x1102   :  { %v1926_v30 = vadd.f32 %v1922_v27, %v1722_v54  ;;  %v1917_v32 = vadd.f32 %v1916_v29, %v1843_v23 }
0x1104   :  { %v1925_v33 = vadd.f32 %v1917_v32, %v1721_v53  ;;  %v1930_v34 = vsel %vm55_vm0, %v1926_v30, 0.0  ;;  %v1936_v36 = vmul.f32 %v1926_v30, %v1926_v30 }
0x1105   :  { %1931 = vadd.xlane.f32.xlu1 %v1930_v34 }
0x1106   :  { %v1927_v37 = vsel %vm55_vm0, %v1925_v33, 0.0  ;;  %v1935_v38 = vmul.f32 %v1925_v33, %v1925_v33  ;;  %v1940_v39 = vsel %vm55_vm0, %v1936_v36, 0.0 }
0x1107   :  { %1928 = vadd.xlane.f32.xlu0 %v1927_v37 }
0x1108   :  { %v1937_v40 = vsel %vm55_vm0, %v1935_v38, 0.0 }
0x1109   :  { %1941 = vadd.xlane.f32.xlu1 %v1940_v39 }
0x110b   :  { %1938 = vadd.xlane.f32.xlu0 %v1937_v40 }
0x111a   :  { %2140 = vrot.lane.b32.xlu1 %v2295_v11, %s2677_s1 }
0x118e   :  { %v1932_v41 = vpop.xlane.xlu1 %1931 }
0x118f   :  { %v1934_v42 = vmul.f32 0.03125, %v1932_v41 }
0x1190   :  { %v1929_v9 = vpop.xlane.xlu0 %1928 }
0x1191   :  { %v1933_v44 = vmul.f32 0.03125, %v1929_v9  ;;  %v1946_v48 = vmul.f32 %v1934_v42, %v1934_v42  ;;  %v1952_v55 = vsub.f32 %v1926_v30, %v1934_v42 }
0x1192   :  { %v1942_v46 = vpop.xlane.xlu1 %1941 }
0x1193   :  { %v1944_v8 = vmul.f32 0.03125, %v1942_v46  ;;  %v1945_v26 = vmul.f32 %v1933_v44, %v1933_v44  ;;  %v1951_v57 = vsub.f32 %v1925_v33, %v1933_v44 }
0x1194   :  { %v1939_v22 = vpop.xlane.xlu0 %1938 }
0x1195   :  { %v1948_v49 = vsub.f32 %v1944_v8, %v1946_v48  ;;  %v1943_v51 = vmul.f32 0.03125, %v1939_v22 }
0x1196   :  { %v2141_v21 = vpop.permute.xlu1 %2140 }
0x1197   :  { %v1950_v45 = vmax.f32 %v1948_v49, 0.0  ;;  %v1947_v52 = vsub.f32 %v1943_v51, %v1945_v26 }
0x1199   :  { %v1954_v53 = vadd.f32 1e-12, %v1950_v45  ;;  %v1949_v54 = vmax.f32 %v1947_v52, 0.0 }
0x119b   :  { %2670 = vrsqrt.f32 %v1954_v53  ;;  %v1953_v62 = vadd.f32 1e-12, %v1949_v54 }
0x119d   :  { %2672 = vrsqrt.f32 %v1953_v62 }
0x11a8   :  { %v2671_v56 = vpop.eup %2670 }
0x11a9   :  { %v1958_v58 = vmul.f32 %v2671_v56, %v1952_v55 }
0x11aa   :  { %v2673_v59 = vpop.eup %2672 }
0x11ab   :  { %v1964_v60 = vmul.f32 %v1962_v63, %v1958_v58  ;;  %v1957_v61 = vmul.f32 %v2673_v59, %v1951_v57 }
0x11ad   :  { %v1970_v0 = vadd.f32 %v1968_v47, %v1964_v60  ;;  %v1963_v1 = vmul.f32 %v1962_v63, %v1957_v61 }
0x11af   :  { %2574 = vmatpush3.msra.mxu0 %v1970_v0  ;;  %v1969_v3 = vadd.f32 %v1968_v47, %v1963_v1 }
0x11b0   :  { %2575 = vmatprep.subr.mxu0 %v2679_v50 }
0x11b1   :  { %2576 = vmatpush3.msra.mxu0 %v1969_v3 }
0x11b2   :  { %2578 = vmatmul.mubr.msk.f32.vlgmr.msra.gmra.mxu0 %vm143_vm1, %v1971_v4  ;;  %2580 = vmatprep.subr.mxu0 %v2679_v50 }
0x11b3   :  { %2581 = vmatpush3.msra.mxu0 %v2049_v31  ;;  %2588 = vmatprep.mubr.msk.f32.mxu0 %vm2680_vm3, %v2679_v50 }
0x11b4   :  { %2582 = vmatprep.subr.mxu0 %v2679_v50 }
0x11b5   :  { %2583 = vmatpush3.msra.mxu0 %v2048_v7 }
0x11b6   :  { %2584 = vmatprep.subr.mxu0 %v2679_v50 }
0x11b7   :  { %2585 = vmatpush3.msra.mxu0 %v2047_v35 }
0x11b8   :  { %2586 = vmatprep.subr.mxu0 %v2679_v50 }
0x11b9   :  { %2587 = vmatpush3.msra.mxu0 %v2046_v2 }
0x1272   :  { %v2041_v15 = vpop.f32.mrf.mxu0 }
0x1273   :  { %2218 = vst.msk [vmem:[%s3185_s11] sm:$0x3] %vm2217_vm4, %v2041_v15  ;;  %2589 = vmatmul.mubr.msk.f32.vlgmr.msra.gmra.mxu0 %vm55_vm0, %v2041_v15 }
0x1274   :  { %v2579_v16 = vpop.f32.mrf.mxu0 }
0x1333   :  { %v2125_v19 = vpop.f32.mrf.mxu0 }
0x1334   :  { %v2126_v28 = vadd.f32 %v2295_v11, %v2125_v19 }
0x1335   :  { %v2590_v5 = vpop.f32.mrf.mxu0 }
0x1336   :  { %vm2129_vm5 = vcmp.gt.f32.partialorder %v2126_v28, 0.0  ;;  %v2130_v43 = vmul.f32 0.01, %v2126_v28 }
0x1338   :  { %v2131_v20 = vsel %vm2129_vm5, %v2126_v28, %v2130_v43 }
0x1339   :  { %2608 = vmatmul.mubr.msk.f32.vlgmr.msra.gmra.mxu1 %vm878_vm2, %v2131_v20 }
0x13f9   :  { %v2212_v23 = vpop.f32.mrf.mxu1 }
0x13fa   :  { %v2213_v24 = vadd.f32 %v2212_v23, %v2141_v21 }
0x13fb   :  { %v2609_v27 = vpop.f32.mrf.mxu1 }
0x13fc   :  { %2220 = vrot.lane.b32.xlu0 %v2213_v24, %s2681_s15 }
0x146e   :  { %v2221_v29 = vpop.permute.xlu0 %2220 }
0x146f   :  { %2224 = vst.msk [vmem:[%s3185_s11] sm:$0x3] %vm2223_vm6, %v2221_v29 }

</bundles_post_ra>
